<compile_context>
chip_gen: v6e
topology: v6e:2x2x1
jax: 0.10.0
libtpu: 0.0.40
codegen_flags: <defaults>
</compile_context>

<pallas_src>
import jax
import jax.numpy as jnp
from jax.experimental import pallas as pl
from jax.experimental.pallas import tpu as pltpu

LAYER_SIZES = [784, 520, 320, 240, 120, 10]      # logical (PyTorch) sizes
PADDED_SIZES = [784, 640, 384, 256, 128, 128]    # lane-aligned sizes used on-chip

TB_MAX = 1024                                    # max batch-tile rows per grid step


def _cdiv(a, b):
    return -(-a // b)


def _round_up(a, m):
    return _cdiv(a, m) * m


def _choose_batch_tile(batch):
    """Pick a sublane-aligned batch tile giving an even number of grid steps
    (>=2 when possible) so v7x's two TensorCores both get work; cap at TB_MAX."""
    tb = min(TB_MAX, max(8, _round_up(_cdiv(batch, 2), 8)))
    steps = _cdiv(batch, tb)
    if steps > 1 and steps % 2 == 1:
        # Shrink the tile slightly so the step count becomes even.
        tb = max(8, _round_up(_cdiv(batch, steps + 1), 8))
    return tb


def mlp_kernel(x_ref,
               w1_ref, b1_ref,
               w2_ref, b2_ref,
               w3_ref, b3_ref,
               w4_ref, b4_ref,
               w5_ref, b5_ref,
               o_ref):
    def layer(h_bf16, w_ref, b_ref, relu):
        # bf16 x bf16 MXU matmul, f32 accumulation; bias + ReLU epilogue in f32.
        y = jnp.dot(h_bf16, w_ref[...], preferred_element_type=jnp.float32) + b_ref[...]
        if relu:
            # Keep inter-layer activations bf16: halves VMEM staging between layers.
            return jnp.maximum(y, 0.0).astype(jnp.bfloat16)
        return y

    # Single in-kernel cast; a bf16 input tile passes through with no extra work.
    h = x_ref[...].astype(jnp.bfloat16)             # (TB, 784)
    h = layer(h, w1_ref, b1_ref, True)              # (TB, 640)
    h = layer(h, w2_ref, b2_ref, True)              # (TB, 384)
    h = layer(h, w3_ref, b3_ref, True)              # (TB, 256)
    h = layer(h, w4_ref, b4_ref, True)              # (TB, 128)
    o_ref[...] = layer(h, w5_ref, b5_ref, False).astype(o_ref.dtype)  # (TB, 128)


def init_params(key):
    """nn.Linear-style uniform(-1/sqrt(fan_in), +) init, zero-padded to lane-aligned
    shapes; weights cast to bf16 (biases stay f32)."""
    params = []
    for i in range(len(LAYER_SIZES) - 1):
        fan_in, fan_out = LAYER_SIZES[i], LAYER_SIZES[i + 1]
        pin, pout = PADDED_SIZES[i], PADDED_SIZES[i + 1]
        key, kw, kb = jax.random.split(key, 3)
        bound = 1.0 / jnp.sqrt(jnp.float32(fan_in))
        # Stored (in, out) so the kernel computes x @ W  (== PyTorch x @ weight.T).
        w = jax.random.uniform(kw, (fan_in, fan_out), jnp.float32, -bound, bound)
        b = jax.random.uniform(kb, (1, fan_out), jnp.float32, -bound, bound)
        w_pad = jnp.zeros((pin, pout), jnp.float32).at[:fan_in, :fan_out].set(w)
        b_pad = jnp.zeros((1, pout), jnp.float32).at[:, :fan_out].set(b)
        params.append((w_pad.astype(jnp.bfloat16), b_pad))
    return params


@jax.jit
def net_forward(x, params):
    # Matches `x = x.view(-1, 784)` in the PyTorch forward.  The caller's dtype is
    # preserved (pass bf16 to halve the input DMA; no wrapper-side cast is added).
    x2d = x.reshape(-1, PADDED_SIZES[0])
    batch = x2d.shape[0]

    tb = _choose_batch_tile(batch)
    grid = (_cdiv(batch, tb),)

    flat_params = []
    in_specs = [pl.BlockSpec((tb, PADDED_SIZES[0]), lambda i: (i, 0))]
    for w, b in params:
        flat_params.extend([w, b])
        # Full-array blocks with constant index -> DMA'd once, VMEM-resident.
        # (Default double-buffering of these ~1.8 MB of weights is accounted for
        #  in the 48 MiB VMEM limit; pl.Buffered(1) would reclaim it on v7x.)
        in_specs.append(pl.BlockSpec(w.shape, lambda i: (0, 0)))
        in_specs.append(pl.BlockSpec(b.shape, lambda i: (0, 0)))

    out_padded = pl.pallas_call(
        mlp_kernel,
        out_shape=jax.ShapeDtypeStruct((batch, PADDED_SIZES[-1]), jnp.float32),
        grid=grid,
        in_specs=in_specs,
        out_specs=pl.BlockSpec((tb, PADDED_SIZES[-1]), lambda i: (i, 0)),
        compiler_params=pltpu.CompilerParams(
            dimension_semantics=("parallel",),
            vmem_limit_bytes=48 << 20,
        ),
    )(x2d, *flat_params)

    return out_padded[:, :LAYER_SIZES[-1]]


def reference_forward(x, params):
    """Pure-JAX reference mirroring the kernel's dtype policy exactly
    (bf16 weights/activations, f32 accumulation and epilogue)."""
    h = x.reshape(-1, PADDED_SIZES[0]).astype(jnp.bfloat16)
    y = None
    for i, (w, b) in enumerate(params):
        y = jnp.dot(h, w, preferred_element_type=jnp.float32) + b
        if i < len(params) - 1:
            h = jnp.maximum(y, 0.0).astype(jnp.bfloat16)
    return y[:, :LAYER_SIZES[-1]]


if __name__ == "__main__":
    key = jax.random.PRNGKey(0)
    key, kx = jax.random.split(key)

    params = init_params(key)

    # Small MNIST-like input: batch=2, 1x28x28 -> view(-1, 784).  Single grid step
    # (latency-bound regime; throughput knobs only show up at realistic batch).
    x = jax.random.normal(kx, (2, 1, 28, 28), jnp.float32)
    out = jax.block_until_ready(net_forward(x, params))
    ref = reference_forward(x, params)
    assert out.shape == (2, 10), out.shape
    assert jnp.allclose(out, ref, atol=5e-3, rtol=5e-3), "mismatch vs reference (B=2)"

    # Multi-step grid: B=130 -> tile=72, 2 grid steps (even -> both v7x TCs busy),
    # partial last block exercises the pipelined masked writeback.
    key, kx2 = jax.random.split(key)
    x_big = jax.random.normal(kx2, (130, 1, 28, 28), jnp.float32)
    out_big = jax.block_until_ready(net_forward(x_big, params))
    ref_big = reference_forward(x_big, params)
    assert out_big.shape == (130, 10), out_big.shape
    assert jnp.allclose(out_big, ref_big, atol=5e-3, rtol=5e-3), "mismatch vs reference (B=130)"

    print("KERNEL_OK")
</pallas_src>

<mosaic_0001>
module attributes {stable_mosaic.version = 11 : i64} {
  func.func @mlp_kernel(%arg0: i32, %arg1: memref<8x784xf32, #tpu.memory_space<vmem>>, %arg2: memref<784x640xbf16, #tpu.memory_space<vmem>>, %arg3: memref<1x640xf32, #tpu.memory_space<vmem>>, %arg4: memref<640x384xbf16, #tpu.memory_space<vmem>>, %arg5: memref<1x384xf32, #tpu.memory_space<vmem>>, %arg6: memref<384x256xbf16, #tpu.memory_space<vmem>>, %arg7: memref<1x256xf32, #tpu.memory_space<vmem>>, %arg8: memref<256x128xbf16, #tpu.memory_space<vmem>>, %arg9: memref<1x128xf32, #tpu.memory_space<vmem>>, %arg10: memref<128x128xbf16, #tpu.memory_space<vmem>>, %arg11: memref<1x128xf32, #tpu.memory_space<vmem>>, %arg12: memref<8x128xf32, #tpu.memory_space<vmem>>) attributes {dimension_semantics = [#tpu.dimension_semantics<parallel>], iteration_bounds = array<i64: 1>, scalar_prefetch = 0 : i64, scratch_operands = 0 : i64, tpu.core_type = #tpu.core_type<tc>, window_params = [{transform_indices = @transform_0, window_bounds = array<i64: 8, 784>}, {pipeline_mode = #tpu.pipeline_mode<synchronous>, transform_indices = @transform_1, window_bounds = array<i64: 784, 640>}, {pipeline_mode = #tpu.pipeline_mode<synchronous>, transform_indices = @transform_2, window_bounds = array<i64: 1, 640>}, {pipeline_mode = #tpu.pipeline_mode<synchronous>, transform_indices = @transform_3, window_bounds = array<i64: 640, 384>}, {pipeline_mode = #tpu.pipeline_mode<synchronous>, transform_indices = @transform_4, window_bounds = array<i64: 1, 384>}, {pipeline_mode = #tpu.pipeline_mode<synchronous>, transform_indices = @transform_5, window_bounds = array<i64: 384, 256>}, {pipeline_mode = #tpu.pipeline_mode<synchronous>, transform_indices = @transform_6, window_bounds = array<i64: 1, 256>}, {pipeline_mode = #tpu.pipeline_mode<synchronous>, transform_indices = @transform_7, window_bounds = array<i64: 256, 128>}, {pipeline_mode = #tpu.pipeline_mode<synchronous>, transform_indices = @transform_8, window_bounds = array<i64: 1, 128>}, {pipeline_mode = #tpu.pipeline_mode<synchronous>, transform_indices = @transform_9, window_bounds = array<i64: 128, 128>}, {pipeline_mode = #tpu.pipeline_mode<synchronous>, transform_indices = @transform_10, window_bounds = array<i64: 1, 128>}, {transform_indices = @transform_11, window_bounds = array<i64: 8, 128>}]} {
    %c0 = arith.constant 0 : index
    %c0_0 = arith.constant 0 : index
    %0 = vector.load %arg1[%c0, %c0_0] : memref<8x784xf32, #tpu.memory_space<vmem>>, vector<8x784xf32>
    %1 = arith.truncf %0 : vector<8x784xf32> to vector<8x784xbf16>
    %c0_1 = arith.constant 0 : index
    %c0_2 = arith.constant 0 : index
    %2 = vector.load %arg2[%c0_1, %c0_2] : memref<784x640xbf16, #tpu.memory_space<vmem>>, vector<784x640xbf16>
    %cst = arith.constant dense<0.000000e+00> : vector<8x640xf32>
    %3 = tpu.matmul %1, %2, %cst {dimension_numbers = #tpu.dot_dimension_numbers<[1], [0], [0], [1], [0, 0, 1, 1], [], []>} : vector<8x784xbf16>, vector<784x640xbf16>, vector<8x640xf32> -> vector<8x640xf32>
    %c0_3 = arith.constant 0 : index
    %c0_4 = arith.constant 0 : index
    %4 = vector.load %arg3[%c0_3, %c0_4] : memref<1x640xf32, #tpu.memory_space<vmem>>, vector<1x640xf32>
    %5 = vector.broadcast %4 : vector<1x640xf32> to vector<8x640xf32>
    %6 = arith.addf %3, %5 : vector<8x640xf32>
    %cst_5 = arith.constant 0.000000e+00 : f32
    %7 = vector.broadcast %cst_5 : f32 to vector<8x640xf32>
    %8 = arith.maximumf %6, %7 : vector<8x640xf32>
    %9 = arith.truncf %8 : vector<8x640xf32> to vector<8x640xbf16>
    %c0_6 = arith.constant 0 : index
    %c0_7 = arith.constant 0 : index
    %10 = vector.load %arg4[%c0_6, %c0_7] : memref<640x384xbf16, #tpu.memory_space<vmem>>, vector<640x384xbf16>
    %cst_8 = arith.constant dense<0.000000e+00> : vector<8x384xf32>
    %11 = tpu.matmul %9, %10, %cst_8 {dimension_numbers = #tpu.dot_dimension_numbers<[1], [0], [0], [1], [0, 0, 1, 1], [], []>} : vector<8x640xbf16>, vector<640x384xbf16>, vector<8x384xf32> -> vector<8x384xf32>
    %c0_9 = arith.constant 0 : index
    %c0_10 = arith.constant 0 : index
    %12 = vector.load %arg5[%c0_9, %c0_10] : memref<1x384xf32, #tpu.memory_space<vmem>>, vector<1x384xf32>
    %13 = vector.broadcast %12 : vector<1x384xf32> to vector<8x384xf32>
    %14 = arith.addf %11, %13 : vector<8x384xf32>
    %cst_11 = arith.constant 0.000000e+00 : f32
    %15 = vector.broadcast %cst_11 : f32 to vector<8x384xf32>
    %16 = arith.maximumf %14, %15 : vector<8x384xf32>
    %17 = arith.truncf %16 : vector<8x384xf32> to vector<8x384xbf16>
    %c0_12 = arith.constant 0 : index
    %c0_13 = arith.constant 0 : index
    %18 = vector.load %arg6[%c0_12, %c0_13] : memref<384x256xbf16, #tpu.memory_space<vmem>>, vector<384x256xbf16>
    %cst_14 = arith.constant dense<0.000000e+00> : vector<8x256xf32>
    %19 = tpu.matmul %17, %18, %cst_14 {dimension_numbers = #tpu.dot_dimension_numbers<[1], [0], [0], [1], [0, 0, 1, 1], [], []>} : vector<8x384xbf16>, vector<384x256xbf16>, vector<8x256xf32> -> vector<8x256xf32>
    %c0_15 = arith.constant 0 : index
    %c0_16 = arith.constant 0 : index
    %20 = vector.load %arg7[%c0_15, %c0_16] : memref<1x256xf32, #tpu.memory_space<vmem>>, vector<1x256xf32>
    %21 = vector.broadcast %20 : vector<1x256xf32> to vector<8x256xf32>
    %22 = arith.addf %19, %21 : vector<8x256xf32>
    %cst_17 = arith.constant 0.000000e+00 : f32
    %23 = vector.broadcast %cst_17 : f32 to vector<8x256xf32>
    %24 = arith.maximumf %22, %23 : vector<8x256xf32>
    %25 = arith.truncf %24 : vector<8x256xf32> to vector<8x256xbf16>
    %c0_18 = arith.constant 0 : index
    %c0_19 = arith.constant 0 : index
    %26 = vector.load %arg8[%c0_18, %c0_19] : memref<256x128xbf16, #tpu.memory_space<vmem>>, vector<256x128xbf16>
    %cst_20 = arith.constant dense<0.000000e+00> : vector<8x128xf32>
    %27 = tpu.matmul %25, %26, %cst_20 {dimension_numbers = #tpu.dot_dimension_numbers<[1], [0], [0], [1], [0, 0, 1, 1], [], []>} : vector<8x256xbf16>, vector<256x128xbf16>, vector<8x128xf32> -> vector<8x128xf32>
    %c0_21 = arith.constant 0 : index
    %c0_22 = arith.constant 0 : index
    %28 = vector.load %arg9[%c0_21, %c0_22] : memref<1x128xf32, #tpu.memory_space<vmem>>, vector<1x128xf32>
    %29 = vector.broadcast %28 : vector<1x128xf32> to vector<8x128xf32>
    %30 = arith.addf %27, %29 : vector<8x128xf32>
    %cst_23 = arith.constant 0.000000e+00 : f32
    %31 = vector.broadcast %cst_23 : f32 to vector<8x128xf32>
    %32 = arith.maximumf %30, %31 : vector<8x128xf32>
    %33 = arith.truncf %32 : vector<8x128xf32> to vector<8x128xbf16>
    %c0_24 = arith.constant 0 : index
    %c0_25 = arith.constant 0 : index
    %34 = vector.load %arg10[%c0_24, %c0_25] : memref<128x128xbf16, #tpu.memory_space<vmem>>, vector<128x128xbf16>
    %cst_26 = arith.constant dense<0.000000e+00> : vector<8x128xf32>
    %35 = tpu.matmul %33, %34, %cst_26 {dimension_numbers = #tpu.dot_dimension_numbers<[1], [0], [0], [1], [0, 0, 1, 1], [], []>} : vector<8x128xbf16>, vector<128x128xbf16>, vector<8x128xf32> -> vector<8x128xf32>
    %c0_27 = arith.constant 0 : index
    %c0_28 = arith.constant 0 : index
    %36 = vector.load %arg11[%c0_27, %c0_28] : memref<1x128xf32, #tpu.memory_space<vmem>>, vector<1x128xf32>
    %37 = vector.broadcast %36 : vector<1x128xf32> to vector<8x128xf32>
    %38 = arith.addf %35, %37 : vector<8x128xf32>
    %c0_29 = arith.constant 0 : index
    %c0_30 = arith.constant 0 : index
    %39 = vector.load %arg12[%c0_29, %c0_30] : memref<8x128xf32, #tpu.memory_space<vmem>>, vector<8x128xf32>
    tpu.vector_store %arg12[%c0_29, %c0_30], %38 {strides = array<i32>} : memref<8x128xf32, #tpu.memory_space<vmem>>, vector<8x128xf32>,
    return
  }
  func.func @transform_0(%arg0: i32) -> (i32, i32) {
    %c0_i32 = arith.constant 0 : i32
    %c0_i32_0 = arith.constant 0 : i32
    return %arg0, %c0_i32 : i32, i32
  }
  func.func @transform_1(%arg0: i32) -> (i32, i32) {
    %c0_i32 = arith.constant 0 : i32
    %c0_i32_0 = arith.constant 0 : i32
    %c0_i32_1 = arith.constant 0 : i32
    return %c0_i32, %c0_i32_0 : i32, i32
  }
  func.func @transform_2(%arg0: i32) -> (i32, i32) {
    %c0_i32 = arith.constant 0 : i32
    %c0_i32_0 = arith.constant 0 : i32
    %c0_i32_1 = arith.constant 0 : i32
    return %c0_i32, %c0_i32_0 : i32, i32
  }
  func.func @transform_3(%arg0: i32) -> (i32, i32) {
    %c0_i32 = arith.constant 0 : i32
    %c0_i32_0 = arith.constant 0 : i32
    %c0_i32_1 = arith.constant 0 : i32
    return %c0_i32, %c0_i32_0 : i32, i32
  }
  func.func @transform_4(%arg0: i32) -> (i32, i32) {
    %c0_i32 = arith.constant 0 : i32
    %c0_i32_0 = arith.constant 0 : i32
    %c0_i32_1 = arith.constant 0 : i32
    return %c0_i32, %c0_i32_0 : i32, i32
  }
  func.func @transform_5(%arg0: i32) -> (i32, i32) {
    %c0_i32 = arith.constant 0 : i32
    %c0_i32_0 = arith.constant 0 : i32
    %c0_i32_1 = arith.constant 0 : i32
    return %c0_i32, %c0_i32_0 : i32, i32
  }
  func.func @transform_6(%arg0: i32) -> (i32, i32) {
    %c0_i32 = arith.constant 0 : i32
    %c0_i32_0 = arith.constant 0 : i32
    %c0_i32_1 = arith.constant 0 : i32
    return %c0_i32, %c0_i32_0 : i32, i32
  }
  func.func @transform_7(%arg0: i32) -> (i32, i32) {
    %c0_i32 = arith.constant 0 : i32
    %c0_i32_0 = arith.constant 0 : i32
    %c0_i32_1 = arith.constant 0 : i32
    return %c0_i32, %c0_i32_0 : i32, i32
  }
  func.func @transform_8(%arg0: i32) -> (i32, i32) {
    %c0_i32 = arith.constant 0 : i32
    %c0_i32_0 = arith.constant 0 : i32
    %c0_i32_1 = arith.constant 0 : i32
    return %c0_i32, %c0_i32_0 : i32, i32
  }
  func.func @transform_9(%arg0: i32) -> (i32, i32) {
    %c0_i32 = arith.constant 0 : i32
    %c0_i32_0 = arith.constant 0 : i32
    %c0_i32_1 = arith.constant 0 : i32
    return %c0_i32, %c0_i32_0 : i32, i32
  }
  func.func @transform_10(%arg0: i32) -> (i32, i32) {
    %c0_i32 = arith.constant 0 : i32
    %c0_i32_0 = arith.constant 0 : i32
    %c0_i32_1 = arith.constant 0 : i32
    return %c0_i32, %c0_i32_0 : i32, i32
  }
  func.func @transform_11(%arg0: i32) -> (i32, i32) {
    %c0_i32 = arith.constant 0 : i32
    %c0_i32_0 = arith.constant 0 : i32
    return %arg0, %c0_i32 : i32, i32
  }
}

</mosaic_0001>

<bundles_post_ra>
// kernel: net_forward.1
= control target key start
LH: loop header
LB: loop body
LE: loop exit
PB: predicated region body
PF: predicated region fallthrough
CT: control target
= control target key end

     0   :  { %16 = vsyncpa [#allocation3], 0  ;;  %s5742_s0 = inlined_call_operand.vmem [shape: f32[2,784], index: 0, kind: input, shape index: {}]   ;;  %s5743_s1 = inlined_call_operand.hbm [shape: bf16[784,640], index: 1, kind: input, shape index: {}]   ;;  %s5744_s2 = inlined_call_operand.vmem [shape: f32[1,640], index: 2, kind: input, shape index: {}]   ;;  %s5745_s3 = inlined_call_operand.hbm [shape: bf16[640,384], index: 3, kind: input, shape index: {}]   ;;  %s5746_s4 = inlined_call_operand.vmem [shape: f32[1,384], index: 4, kind: input, shape index: {}]   ;;  %s5747_s5 = inlined_call_operand.hbm [shape: bf16[384,256], index: 5, kind: input, shape index: {}]   ;;  %s5748_s6 = inlined_call_operand.vmem [shape: f32[1,256], index: 6, kind: input, shape index: {}]   ;;  %s5749_s7 = inlined_call_operand.vmem [shape: bf16[256,128], index: 7, kind: input, shape index: {}]   ;;  %s5750_s8 = inlined_call_operand.vmem [shape: f32[1,128], index: 8, kind: input, shape index: {}]   ;;  %s5751_s9 = inlined_call_operand.vmem [shape: bf16[128,128], index: 9, kind: input, shape index: {}]   ;;  %s5752_s10 = inlined_call_operand.vmem [shape: f32[1,128], index: 10, kind: input, shape index: {}]   ;;  %s5753_s11 = inlined_call_operand.hbm [shape: f32[2,128], index: 11, kind: output, shape index: {}]  }
   0x1   :  { %17 = vsyncpa [#allocation6], 0 }
   0x2   :  { %18 = vsyncpa [#allocation4], 0  ;;  %s5391_s17 = smov [#allocation5]  }
   0x3   :  { %s40_s18 = sshll.u32 %s5391_s17, 4  ;;  %s41_s18 = int_to_ptr.vmem [resolvable:$true] %s40_s18 }
   0x4   :  { %s5313_s19 = scalar_lea.vmem %s41_s18, 15360  ;;  %p5318_p1 = scmp.lt.s32.totalorder %s41_s18, %s41_s18 }
   0x5   :  { %p5314_p0 = scmp.ne.s32.totalorder %s41_s18, %s5313_s19  ;;  %p5319_p2 = scmp.lt.s32.totalorder %s5313_s19, %s5313_s19 }
   0x7   :  { %p5320_p3 = por %p5319_p2, %p5318_p1 }
   0x9   :  { %p5321_p4 = pnand %p5320_p3, %p5314_p0 }
   0xb   :  { %5324 = shalt.err (!%p5321_p4)
}
   0xc   :  { %s5392_s20 = smov 192   ;;  %s5393_s21 = smov 12  }
   0xd   :  { %46 = dma.hbm_to_vmem [thread:$0]  %s5745_s3, 15360, %s41_s18, [#allocation6], %s5392_s20, %s5392_s20, %s5393_s21  }
   0xe   :  { %s5394_s24 = smov [#allocation2]  }
   0xf   :  { %s26_s25 = sshll.u32 %s5394_s24, 4  ;;  %s27_s25 = int_to_ptr.vmem [resolvable:$true] %s26_s25 }
  0x10   :  { %s5333_s26 = scalar_lea.vmem %s27_s25, 31360  ;;  %p5338_p6 = scmp.lt.s32.totalorder %s27_s25, %s27_s25 }
  0x11   :  { %p5334_p5 = scmp.ne.s32.totalorder %s27_s25, %s5333_s26  ;;  %p5339_p7 = scmp.lt.s32.totalorder %s5333_s26, %s5333_s26 }
  0x13   :  { %p5340_p8 = por %p5339_p7, %p5338_p6 }
  0x15   :  { %p5341_p9 = pnand %p5340_p8, %p5334_p5 }
  0x17   :  { %5344 = shalt.err (!%p5341_p9)
}
  0x18   :  { %s5395_s27 = smov 320   ;;  %s5396_s28 = smov 20  }
  0x19   :  { %32 = dma.hbm_to_vmem [thread:$0]  %s5743_s1, 31360, %s27_s25, [#allocation3], %s5395_s27, %s5395_s27, %s5396_s28  }
  0x1a   :  { %s5397_s12 = smov [#allocation7]  }
  0x1b   :  { %s54_s13 = sshll.u32 %s5397_s12, 4  ;;  %s55_s13 = int_to_ptr.vmem [resolvable:$true] %s54_s13 }
  0x1c   :  { %s5353_s3 = scalar_lea.vmem %s55_s13, 6144  ;;  %p5358_p11 = scmp.lt.s32.totalorder %s55_s13, %s55_s13 }
  0x1d   :  { %p5354_p10 = scmp.ne.s32.totalorder %s55_s13, %s5353_s3  ;;  %p5359_p12 = scmp.lt.s32.totalorder %s5353_s3, %s5353_s3 }
  0x1f   :  { %p5360_p13 = por %p5359_p12, %p5358_p11 }
  0x21   :  { %p5361_p0 = pnand %p5360_p13, %p5354_p10 }
  0x23   :  { %5364 = shalt.err (!%p5361_p0)
}
  0x24   :  { %s5398_s14 = smov 128   ;;  %s5399_s15 = smov 8  }
  0x25   :  { %60 = dma.hbm_to_vmem [thread:$0]  %s5747_s5, 6144, %s55_s13, [#allocation6], %s5398_s14, %s5398_s14, %s5399_s15  }
  0x26   :  { %5385 = dma.done.wait [#allocation3], 31360  }
  0x27   :  { %5386 = vsyncadd [#allocation3], 4294935936 }
  0x28   :  { %5387 = dma.done.wait [#allocation6], 21504  }
  0x29   :  { %5388 = vsyncadd [#allocation6], 4294945792  ;;  %v4694_v0 = vld [vmem:[#allocation2 + $0x11c] ss:$20 sps:$4 sm:$0xff]   ;;  %v4698_v2 = vld [vmem:[#allocation2 + $0x118] ss:$20 sps:$4 sm:$0xff]   ;;  %v104_v40 = vlaneseq }
  0x2a   :  { %v4696_v1 = vld [vmem:[#allocation2 + $0x39c] ss:$20 sps:$4 sm:$0xff]   ;;  %1781 = vmatprep.subr.bf16.mxu0 %v4694_v0  ;;  %v4699_v3 = vld [vmem:[#allocation2 + $0x398] ss:$20 sps:$4 sm:$0xff]   ;;  %v4700_v4 = vld [vmem:[#allocation2 + $0xf4] ss:$20 sps:$4 sm:$0xff]  }
  0x2b   :  { %1822 = vmatprep.subr.bf16.mxu1 %v4696_v1  ;;  %1782 = vmatpush1.bf16.msra.mxu0 %v4698_v2  ;;  %v4702_v5 = vld [vmem:[#allocation2 + $0x374] ss:$20 sps:$4 sm:$0xff]   ;;  %v4704_v6 = vld [vmem:[#allocation2 + $0xf0] ss:$20 sps:$4 sm:$0xff]   ;;  %v4706_v8 = vld [vmem:[#allocation2 + $0xcc] ss:$20 sps:$4 sm:$0xff]  }
  0x2c   :  { %1823 = vmatpush1.bf16.msra.mxu1 %v4699_v3  ;;  %1783 = vmatprep.subr.bf16.mxu0 %v4700_v4  ;;  %v4705_v7 = vld [vmem:[#allocation2 + $0x370] ss:$20 sps:$4 sm:$0xff]   ;;  %v4708_v9 = vld [vmem:[#allocation2 + $0x34c] ss:$20 sps:$4 sm:$0xff]   ;;  %v4710_v10 = vld [vmem:[#allocation2 + $0xc8] ss:$20 sps:$4 sm:$0xff]  }
  0x2d   :  { %1824 = vmatprep.subr.bf16.mxu1 %v4702_v5  ;;  %v4711_v11 = vld [vmem:[#allocation2 + $0x348] ss:$20 sps:$4 sm:$0xff]   ;;  %v4712_v12 = vld [vmem:[#allocation2 + $0xa4] ss:$20 sps:$4 sm:$0xff]   ;;  %v4716_v14 = vld [vmem:[#allocation2 + $0xa0] ss:$20 sps:$4 sm:$0xff]  }
  0x2e   :  { %v4714_v13 = vld [vmem:[#allocation2 + $0x324] ss:$20 sps:$4 sm:$0xff]   ;;  %v4717_v15 = vld [vmem:[#allocation2 + $0x320] ss:$20 sps:$4 sm:$0xff]   ;;  %v4718_v16 = vld [vmem:[#allocation2 + $0x7c] ss:$20 sps:$4 sm:$0xff]  }
  0x2f   :  { %1784 = vmatpush1.bf16.msra.mxu0 %v4704_v6  ;;  %v4720_v17 = vld [vmem:[#allocation2 + $0x2fc] ss:$20 sps:$4 sm:$0xff]   ;;  %v4722_v18 = vld [vmem:[#allocation2 + $0x78] ss:$20 sps:$4 sm:$0xff]   ;;  %v4724_v20 = vld [vmem:[#allocation2 + $0x54] ss:$20 sps:$4 sm:$0xff]  }
  0x30   :  { %1825 = vmatpush1.bf16.msra.mxu1 %v4705_v7  ;;  %1785 = vmatprep.subr.bf16.mxu0 %v4706_v8  ;;  %v4723_v19 = vld [vmem:[#allocation2 + $0x2f8] ss:$20 sps:$4 sm:$0xff]   ;;  %v4726_v21 = vld [vmem:[#allocation2 + $0x2d4] ss:$20 sps:$4 sm:$0xff]   ;;  %v4728_v22 = vld [vmem:[#allocation2 + $0x50] ss:$20 sps:$4 sm:$0xff]  }
  0x31   :  { %1826 = vmatprep.subr.bf16.mxu1 %v4708_v9  ;;  %v4729_v23 = vld [vmem:[#allocation2 + $0x2d0] ss:$20 sps:$4 sm:$0xff]   ;;  %v4730_v24 = vld [vmem:[#allocation2 + $0x2c] ss:$20 sps:$4 sm:$0xff]   ;;  %v4734_v26 = vld [vmem:[#allocation2 + $0x28] ss:$20 sps:$4 sm:$0xff]  }
  0x32   :  { %v4732_v25 = vld [vmem:[#allocation2 + $0x2ac] ss:$20 sps:$4 sm:$0xff]   ;;  %v4735_v27 = vld [vmem:[#allocation2 + $0x2a8] ss:$20 sps:$4 sm:$0xff]   ;;  %v4736_v28 = vld [vmem:[#allocation2 + $0x4] ss:$20 sps:$4 sm:$0xff]  }
  0x33   :  { %1786 = vmatpush1.bf16.msra.mxu0 %v4710_v10  ;;  %v4738_v29 = vld [vmem:[#allocation2 + $0x284] ss:$20 sps:$4 sm:$0xff]   ;;  %v4740_v30 = vld [vmem:[#allocation2] ss:$20 sps:$4 sm:$0xff]   ;;  %v4742_v32 = vld [vmem:[#allocation2 + $0x25c] ss:$20 sps:$4 sm:$0xff]  }
  0x34   :  { %1827 = vmatpush1.bf16.msra.mxu1 %v4711_v11  ;;  %1787 = vmatprep.subr.bf16.mxu0 %v4712_v12  ;;  %v4741_v31 = vld [vmem:[#allocation2 + $0x280] ss:$20 sps:$4 sm:$0xff]   ;;  %v4744_v33 = vld [vmem:[#allocation2 + $0x4dc] ss:$20 sps:$4 sm:$0xff]   ;;  %v4746_v34 = vld [vmem:[#allocation2 + $0x258] ss:$20 sps:$4 sm:$0xff]  }
  0x35   :  { %1828 = vmatprep.subr.bf16.mxu1 %v4714_v13  ;;  %v4747_v35 = vld [vmem:[#allocation2 + $0x4d8] ss:$20 sps:$4 sm:$0xff]   ;;  %v4748_v36 = vld [vmem:[#allocation2 + $0x234] ss:$20 sps:$4 sm:$0xff]   ;;  %v5400_v38 = vmov 1983009808  }
  0x36   :  { %v4750_v37 = vld [vmem:[#allocation2 + $0x4b4] ss:$20 sps:$4 sm:$0xff]   ;;  %v102_v39 = vunpack.c.l.s4 %v5400_v38  ;;  %v4752_v41 = vld [vmem:[#allocation2 + $0x230] ss:$20 sps:$4 sm:$0xff]   ;;  %v4754_v43 = vld [vmem:[#allocation2 + $0x20c] ss:$20 sps:$4 sm:$0xff]  }
  0x37   :  { %1788 = vmatpush1.bf16.msra.mxu0 %v4716_v14  ;;  %v4753_v42 = vld [vmem:[#allocation2 + $0x4b0] ss:$20 sps:$4 sm:$0xff]   ;;  %v4756_v44 = vld [vmem:[#allocation2 + $0x48c] ss:$20 sps:$4 sm:$0xff]   ;;  %v5476_v46 = vshrl.u32 %v104_v40, 7  ;;  %vm1777_vm0 = vcmask 130048  }
  0x38   :  { %1829 = vmatpush1.bf16.msra.mxu1 %v4717_v15  ;;  %1789 = vmatprep.subr.bf16.mxu0 %v4718_v16  ;;  %v103_v45 = vunpack.c.0.s8 %v102_v39  ;;  %v4758_v47 = vld [vmem:[#allocation2 + $0x208] ss:$20 sps:$4 sm:$0xff]   ;;  %v4760_v49 = vld [vmem:[#allocation2 + $0x1e4] ss:$20 sps:$4 sm:$0xff]   ;;  %v4764_v51 = vld [vmem:[#allocation2 + $0x1e0] ss:$20 sps:$4 sm:$0xff]  }
  0x39   :  { %1830 = vmatprep.subr.bf16.mxu1 %v4720_v17  ;;  %v4759_v48 = vld [vmem:[#allocation2 + $0x488] ss:$20 sps:$4 sm:$0xff]   ;;  %v4762_v50 = vld [vmem:[#allocation2 + $0x464] ss:$20 sps:$4 sm:$0xff]   ;;  %v4765_v52 = vld [vmem:[#allocation2 + $0x460] ss:$20 sps:$4 sm:$0xff]  }
  0x3a   :  { %v5479_v53 = vsub.s32 %v103_v45, %v5476_v46  ;;  %v4766_v54 = vld [vmem:[#allocation2 + $0x1bc] ss:$20 sps:$4 sm:$0xff]   ;;  %v4770_v63 = vld [vmem:[#allocation2 + $0x1b8] ss:$20 sps:$4 sm:$0xff]   ;;  %v4772_v2 = vld [vmem:[#allocation2 + $0x194] ss:$20 sps:$4 sm:$0xff]  }
  0x3b   :  { %1790 = vmatpush1.bf16.msra.mxu0 %v4722_v18  ;;  %v4768_v55 = vld [vmem:[#allocation2 + $0x43c] ss:$20 sps:$4 sm:$0xff]   ;;  %v4771_v0 = vld [vmem:[#allocation2 + $0x438] ss:$20 sps:$4 sm:$0xff]   ;;  %v4774_v4 = vld [vmem:[#allocation2 + $0x414] ss:$20 sps:$4 sm:$0xff]  }
  0x3c   :  { %1831 = vmatpush1.bf16.msra.mxu1 %v4723_v19  ;;  %1791 = vmatprep.subr.bf16.mxu0 %v4724_v20  ;;  %v4790_v56 = vld [vmem:[%s5742_s0] ss:$14 sps:$4 sm:$0xff]   ;;  %v4792_v57 = vld [vmem:[%s5742_s0 + $0x1c] ss:$14 sps:$4 sm:$0xff]   ;;  %v4794_v58 = vld [vmem:[%s5742_s0 + $0x4] ss:$14 sps:$4 sm:$0xff]  }
  0x3d   :  { %1832 = vmatprep.subr.bf16.mxu1 %v4726_v21  ;;  %v4795_v59 = vld [vmem:[%s5742_s0 + $0x20] ss:$14 sps:$4 sm:$0xff]   ;;  %v107_v60 = vrot.slane %v4790_v56, %v5479_v53  ;;  %v121_v61 = vrot.slane %v4792_v57, %v5479_v53  ;;  %v114_v62 = vrot.slane %v4794_v58, %v5479_v53  ;;  %v4782_v12 = vld [vmem:[#allocation2 + $0x168] ss:$20 sps:$4 sm:$0xff]   ;;  %v4784_v14 = vld [vmem:[#allocation2 + $0x144] ss:$20 sps:$4 sm:$0xff]  }
  0x3e   :  { %v128_v1 = vrot.slane %v4795_v59, %v5479_v53  ;;  %v4776_v6 = vld [vmem:[#allocation2 + $0x190] ss:$20 sps:$4 sm:$0xff]   ;;  %v4778_v9 = vld [vmem:[#allocation2 + $0x16c] ss:$20 sps:$4 sm:$0xff]   ;;  %v4783_v13 = vld [vmem:[#allocation2 + $0x3e8] ss:$20 sps:$4 sm:$0xff]  }
  0x3f   :  { %1792 = vmatpush1.bf16.msra.mxu0 %v4728_v22  ;;  %v130_v3 = vcombine.high %v107_v60, %v121_v61  ;;  %v4777_v8 = vld [vmem:[#allocation2 + $0x410] ss:$20 sps:$4 sm:$0xff]   ;;  %v4780_v11 = vld [vmem:[#allocation2 + $0x3ec] ss:$20 sps:$4 sm:$0xff]   ;;  %v129_v17 = vcombine.low %v107_v60, %v121_v61  ;;  %v4808_v38 = vld [vmem:[#allocation2 + $0x5c8] ss:$20 sps:$4 sm:$0xff]  }
  0x40   :  { %1833 = vmatpush1.bf16.msra.mxu1 %v4729_v23  ;;  %1793 = vmatprep.subr.bf16.mxu0 %v4730_v24  ;;  %v132_v5 = vcombine.high %v114_v62, %v128_v1  ;;  %v4786_v15 = vld [vmem:[#allocation2 + $0x3c4] ss:$20 sps:$4 sm:$0xff]   ;;  %v131_v18 = vcombine.low %v114_v62, %v128_v1  ;;  %v4813_v19 = vld [vmem:[%s5742_s0 + $0x28] ss:$14 sps:$4 sm:$0x33]   ;;  %vm5403_vm1 = vmmov 0  }
  0x41   :  { %1834 = vmatprep.subr.bf16.mxu1 %v4732_v25  ;;  %v5497_v7 = vpack.c.bf16 %v130_v3, %v130_v3  ;;  %v4811_v16 = vld [vmem:[%s5742_s0 + $0xc] ss:$14 sps:$4 sm:$0x33]   ;;  %v4788_v20 = vld [vmem:[#allocation2 + $0x140] ss:$20 sps:$4 sm:$0xff]   ;;  %v5509_v24 = vpack.c.bf16 %v129_v17, %v129_v17 }
  0x42   :  { %v5499_v10 = vpack.c.bf16 %v132_v5, %v132_v5  ;;  %v4789_v21 = vld [vmem:[#allocation2 + $0x3c0] ss:$20 sps:$4 sm:$0xff]   ;;  %v4798_v22 = vld [vmem:[#allocation2 + $0x61c] ss:$20 sps:$4 sm:$0xff]   ;;  %v4801_v23 = vld [vmem:[#allocation2 + $0x784] ss:$20 sps:$4 sm:$0xff]   ;;  %v5511_v25 = vpack.c.bf16 %v131_v18, %v131_v18 }
  0x43   :  { %1794 = vmatpush1.bf16.msra.mxu0 %v4734_v26  ;;  %1813 = vmatprep.mubr.bf16.mxu0 %v5497_v7  ;;  %v150_v26 = vrot.slane %v4811_v16, %v5479_v53  ;;  %v4817_v39 = vld [vmem:[#allocation2 + $0xfc] ss:$20 sps:$4 sm:$0xff]   ;;  %v4820_v40 = vld [vmem:[#allocation2 + $0x5a4] ss:$20 sps:$4 sm:$0xff]   ;;  %v4847_v1 = vld [vmem:[#allocation2 + $0x34] ss:$20 sps:$4 sm:$0xff]  }
  0x44   :  { %1835 = vmatpush1.bf16.msra.mxu1 %v4735_v27  ;;  %1795 = vmatprep.subr.bf16.mxu0 %v4736_v28  ;;  %v164_v27 = vrot.slane %v4813_v19, %v5479_v53  ;;  %v4796_v28 = vld [vmem:[#allocation2 + $0x618] ss:$20 sps:$4 sm:$0xff]   ;;  %v4821_v45 = vld [vmem:[#allocation2 + $0xd0] ss:$20 sps:$4 sm:$0xff]   ;;  %v4836_v56 = vld [vmem:[#allocation2 + $0x528] ss:$20 sps:$4 sm:$0xff]  }
  0x45   :  { %1836 = vmatprep.subr.bf16.mxu1 %v4738_v29  ;;  %1854 = vmatprep.mubr.bf16.mxu1 %v5499_v10  ;;  %v4799_v29 = vld [vmem:[#allocation2 + $0x780] ss:$20 sps:$4 sm:$0xff]   ;;  %v4841_v57 = vld [vmem:[#allocation2 + $0x5c] ss:$20 sps:$4 sm:$0xff]   ;;  %v4844_v58 = vld [vmem:[#allocation2 + $0x504] ss:$20 sps:$4 sm:$0xff]  }
  0x46   :  { %v4893_v59 = vld [vmem:[%s5742_s0 + $0x8] ss:$14 sps:$4 sm:$0xff]   ;;  %v4894_v60 = vld [vmem:[%s5742_s0 + $0x24] ss:$14 sps:$4 sm:$0xff]  }
  0x47   :  { %1796 = vmatpush1.bf16.msra.mxu0 %v4740_v30  ;;  %v4804_v30 = vld [vmem:[#allocation2 + $0x5f4] ss:$20 sps:$4 sm:$0xff]   ;;  %v5530_v61 = vrot.slane %v4893_v59, %v5479_v53  ;;  %v4839_v62 = vld [vmem:[#allocation2 + $0x58] ss:$20 sps:$4 sm:$0xff]   ;;  %v4865_v16 = vld [vmem:[#allocation2 + $0x23c] ss:$20 sps:$4 sm:$0xff]  }
  0x48   :  { %1837 = vmatpush1.bf16.msra.mxu1 %v4741_v31  ;;  %1797 = vmatprep.subr.bf16.mxu0 %v4742_v32  ;;  %v4807_v31 = vld [vmem:[#allocation2 + $0x124] ss:$20 sps:$4 sm:$0xff]   ;;  %v167_v32 = vcombine.low %v150_v26, %v164_v27  ;;  %v4866_v19 = vld [vmem:[#allocation2 + $0x6e0] ss:$20 sps:$4 sm:$0xff]   ;;  %v4916_v59 = vld [vmem:[#allocation2 + $0x328] ss:$20 sps:$4 sm:$0xff]  }
  0x49   :  { %1838 = vmatprep.subr.bf16.mxu1 %v4744_v33  ;;  %v4802_v33 = vld [vmem:[#allocation2 + $0x5f0] ss:$20 sps:$4 sm:$0xff]   ;;  %v4848_v5 = vld [vmem:[#allocation2 + $0x758] ss:$20 sps:$4 sm:$0xff]   ;;  %v4880_v27 = vld [vmem:[#allocation2 + $0x694] ss:$20 sps:$4 sm:$0xff]  }
  0x4a   :  { %v4868_v17 = vld [vmem:[#allocation2 + $0x6e4] ss:$20 sps:$4 sm:$0xff]   ;;  %v4877_v26 = vld [vmem:[#allocation2 + $0x1ec] ss:$20 sps:$4 sm:$0xff]  }
  0x4b   :  { %1798 = vmatpush2.bf16.msra.mxu0 %v4746_v34  ;;  %v5401_v34 = vmov 0   ;;  %v4863_v18 = vld [vmem:[#allocation2 + $0x238] ss:$20 sps:$4 sm:$0xff]  }
  0x4c   :  { %1839 = vmatpush2.bf16.msra.mxu1 %v4747_v35  ;;  %1799 = vmatprep.subr.bf16.mxu0 %v4748_v36  ;;  %v4810_v35 = vld [vmem:[#allocation2 + $0x5cc] ss:$20 sps:$4 sm:$0xff]   ;;  %v5518_v36 = vpack.c.bf16 %v167_v32, %v167_v32 }
  0x4d   :  { %1840 = vmatprep.subr.bf16.mxu1 %v4750_v37  ;;  %v4805_v37 = vld [vmem:[#allocation2 + $0x120] ss:$20 sps:$4 sm:$0xff]  }
  0x4e   :  { %v4881_v32 = vld [vmem:[#allocation2 + $0x1c0] ss:$20 sps:$4 sm:$0xff]  }
  0x4f   :  { %1800 = vmatpush2.bf16.msra.mxu0 %v4752_v41  ;;  %v4815_v41 = vld [vmem:[#allocation2 + $0xf8] ss:$20 sps:$4 sm:$0xff]  }
  0x50   :  { %1841 = vmatpush2.bf16.msra.mxu1 %v4753_v42  ;;  %1801 = vmatprep.subr.bf16.mxu0 %v4754_v43  ;;  %v4818_v42 = vld [vmem:[#allocation2 + $0x5a0] ss:$20 sps:$4 sm:$0xff]  }
  0x51   :  { %1842 = vmatprep.subr.bf16.mxu1 %v4756_v44  ;;  %v4823_v43 = vld [vmem:[#allocation2 + $0xd4] ss:$20 sps:$4 sm:$0xff]   ;;  %v4826_v44 = vld [vmem:[#allocation2 + $0x57c] ss:$20 sps:$4 sm:$0xff]  }
  0x53   :  { %1802 = vmatpush2.bf16.msra.mxu0 %v4758_v47  ;;  %v4824_v47 = vld [vmem:[#allocation2 + $0x578] ss:$20 sps:$4 sm:$0xff]  }
  0x54   :  { %1843 = vmatpush2.bf16.msra.mxu1 %v4759_v48  ;;  %1803 = vmatprep.subr.bf16.mxu0 %v4760_v49  ;;  %v4829_v48 = vld [vmem:[#allocation2 + $0xac] ss:$20 sps:$4 sm:$0xff]   ;;  %v4832_v49 = vld [vmem:[#allocation2 + $0x554] ss:$20 sps:$4 sm:$0xff]  }
  0x55   :  { %1844 = vmatprep.subr.bf16.mxu1 %v4762_v50  ;;  %v4827_v50 = vld [vmem:[#allocation2 + $0xa8] ss:$20 sps:$4 sm:$0xff]  }
  0x57   :  { %1804 = vmatpush2.bf16.msra.mxu0 %v4764_v51  ;;  %v4830_v51 = vld [vmem:[#allocation2 + $0x550] ss:$20 sps:$4 sm:$0xff]  }
  0x58   :  { %1845 = vmatpush2.bf16.msra.mxu1 %v4765_v52  ;;  %1805 = vmatprep.subr.bf16.mxu0 %v4766_v54  ;;  %v4835_v52 = vld [vmem:[#allocation2 + $0x84] ss:$20 sps:$4 sm:$0xff]   ;;  %v4838_v54 = vld [vmem:[#allocation2 + $0x52c] ss:$20 sps:$4 sm:$0xff]  }
  0x59   :  { %1846 = vmatprep.subr.bf16.mxu1 %v4768_v55  ;;  %v4833_v55 = vld [vmem:[#allocation2 + $0x80] ss:$20 sps:$4 sm:$0xff]  }
  0x5b   :  { %1806 = vmatpush2.bf16.msra.mxu0 %v4770_v63  ;;  %v4842_v63 = vld [vmem:[#allocation2 + $0x500] ss:$20 sps:$4 sm:$0xff]  }
  0x5c   :  { %1847 = vmatpush2.bf16.msra.mxu1 %v4771_v0  ;;  %1807 = vmatprep.subr.bf16.mxu0 %v4772_v2  ;;  %v5533_v0 = vrot.slane %v4894_v60, %v5479_v53  ;;  %v4850_v2 = vld [vmem:[#allocation2 + $0x75c] ss:$20 sps:$4 sm:$0xff]   ;;  %v4856_v53 = vld [vmem:[#allocation2 + $0x734] ss:$20 sps:$4 sm:$0xff]  }
  0x5d   :  { %1848 = vmatprep.subr.bf16.mxu1 %v4774_v4  ;;  %v4845_v4 = vld [vmem:[#allocation2 + $0x30] ss:$20 sps:$4 sm:$0xff]   ;;  %v4921_v60 = vld [vmem:[#allocation2 + $0x5d4] ss:$20 sps:$4 sm:$0xff]  }
  0x5e   :  { %v166_v3 = vcombine.high %v5530_v61, %v5533_v0 }
  0x5f   :  { %1808 = vmatpush2.bf16.msra.mxu0 %v4776_v6 }
  0x60   :  { %1849 = vmatpush2.bf16.msra.mxu1 %v4777_v8  ;;  %1809 = vmatprep.subr.bf16.mxu0 %v4778_v9  ;;  %v5537_v6 = vpack.c.bf16 %v166_v3, %v166_v3  ;;  %v4853_v8 = vld [vmem:[#allocation2 + $0xc] ss:$20 sps:$4 sm:$0xff]   ;;  %v4851_v9 = vld [vmem:[#allocation2 + $0x8] ss:$20 sps:$4 sm:$0xff]  }
  0x61   :  { %1850 = vmatprep.subr.bf16.mxu1 %v4780_v11  ;;  %v4854_v11 = vld [vmem:[#allocation2 + $0x730] ss:$20 sps:$4 sm:$0xff]   ;;  %v4928_v3 = vld [vmem:[#allocation2 + $0x2d8] ss:$20 sps:$4 sm:$0xff]  }
  0x63   :  { %1810 = vmatpush2.bf16.msra.mxu0 %v4782_v12  ;;  %v4859_v12 = vld [vmem:[#allocation2 + $0x264] ss:$20 sps:$4 sm:$0xff]  }
  0x64   :  { %1851 = vmatpush2.bf16.msra.mxu1 %v4783_v13  ;;  %1811 = vmatprep.subr.bf16.mxu0 %v4784_v14  ;;  %v4862_v13 = vld [vmem:[#allocation2 + $0x70c] ss:$20 sps:$4 sm:$0xff]  }
  0x65   :  { %1852 = vmatprep.subr.bf16.mxu1 %v4786_v15  ;;  %v4857_v14 = vld [vmem:[#allocation2 + $0x260] ss:$20 sps:$4 sm:$0xff]   ;;  %v4860_v15 = vld [vmem:[#allocation2 + $0x708] ss:$20 sps:$4 sm:$0xff]  }
  0x67   :  { %1812 = vmatpush2.bf16.msra.mxu0 %v4788_v20  ;;  %v4871_v20 = vld [vmem:[#allocation2 + $0x214] ss:$20 sps:$4 sm:$0xff]  }
  0x68   :  { %1853 = vmatpush2.bf16.msra.mxu1 %v4789_v21  ;;  %1863 = vmatprep.subr.bf16.mxu0 %v4798_v22  ;;  %v4874_v21 = vld [vmem:[#allocation2 + $0x6bc] ss:$20 sps:$4 sm:$0xff]  }
  0x69   :  { %1918 = vmatprep.subr.bf16.mxu1 %v4801_v23  ;;  %v4869_v22 = vld [vmem:[#allocation2 + $0x210] ss:$20 sps:$4 sm:$0xff]   ;;  %v4872_v23 = vld [vmem:[#allocation2 + $0x6b8] ss:$20 sps:$4 sm:$0xff]  }
  0x6a   :  { %1814 = vmatmul.mubr.bf16.vlgmr.msra.gmra.mxu0 %v5509_v24 }
  0x6b   :  { %1855 = vmatmul.mubr.bf16.vlgmr.msra.gmra.mxu1 %v5511_v25  ;;  %1864 = vmatpush1.bf16.msra.mxu0 %v4796_v28  ;;  %v4875_v28 = vld [vmem:[#allocation2 + $0x1e8] ss:$20 sps:$4 sm:$0xff]  }
  0x6c   :  { %1919 = vmatpush1.bf16.msra.mxu1 %v4799_v29  ;;  %1865 = vmatprep.subr.bf16.mxu0 %v4804_v30  ;;  %v4878_v29 = vld [vmem:[#allocation2 + $0x690] ss:$20 sps:$4 sm:$0xff]  }
  0x6d   :  { %1936 = vmatprep.mubr.bf16.mxu1 %v5401_v34  ;;  %1945 = vmatprep.subr.bf16.mxu1 %v4807_v31  ;;  %v4883_v30 = vld [vmem:[#allocation2 + $0x1c4] ss:$20 sps:$4 sm:$0xff]   ;;  %v4886_v31 = vld [vmem:[#allocation2 + $0x66c] ss:$20 sps:$4 sm:$0xff]  }
  0x6e   :  { %1895 = vmatprep.mubr.bf16.mxu0 %v5537_v6 }
  0x6f   :  { %1866 = vmatpush1.bf16.msra.mxu0 %v4802_v33  ;;  %v4884_v33 = vld [vmem:[#allocation2 + $0x668] ss:$20 sps:$4 sm:$0xff]  }
  0x70   :  { %1867 = vmatprep.subr.bf16.mxu0 %v4810_v35  ;;  %v4889_v35 = vld [vmem:[#allocation2 + $0x19c] ss:$20 sps:$4 sm:$0xff]  }
  0x73   :  { %4283 = vmatmul.mubr.msk.bf16.vlgmr.msra.gmra.mxu1 %vm1777_vm0, %v5518_v36  ;;  %1868 = vmatpush1.bf16.msra.mxu0 %v4808_v38  ;;  %v4887_v38 = vld [vmem:[#allocation2 + $0x198] ss:$20 sps:$4 sm:$0xff]  }
  0x74   :  { %1946 = vmatpush1.bf16.msra.mxu1 %v4805_v37  ;;  %1869 = vmatprep.subr.bf16.mxu0 %v4820_v40  ;;  %v4892_v37 = vld [vmem:[#allocation2 + $0x644] ss:$20 sps:$4 sm:$0xff]   ;;  %v165_v40 = vcombine.low %v5530_v61, %v5533_v0  ;;  %v4927_v0 = vld [vmem:[#allocation2 + $0x5ac] ss:$20 sps:$4 sm:$0xff]  }
  0x75   :  { %1947 = vmatprep.subr.bf16.mxu1 %v4817_v39  ;;  %1977 = vmatprep.mubr.bf16.mxu1 %v5497_v7  ;;  %v4890_v39 = vld [vmem:[#allocation2 + $0x640] ss:$20 sps:$4 sm:$0xff]   ;;  %v4924_v61 = vld [vmem:[#allocation2 + $0x304] ss:$20 sps:$4 sm:$0xff]  }
  0x77   :  { %1870 = vmatpush1.bf16.msra.mxu0 %v4818_v42  ;;  %v4900_v42 = vld [vmem:[#allocation2 + $0x3a4] ss:$20 sps:$4 sm:$0xff]  }
  0x78   :  { %1948 = vmatpush1.bf16.msra.mxu1 %v4815_v41  ;;  %1871 = vmatprep.subr.bf16.mxu0 %v4826_v44  ;;  %v4897_v41 = vld [vmem:[#allocation2 + $0x174] ss:$20 sps:$4 sm:$0xff]   ;;  %v5542_v44 = vpack.c.bf16 %v165_v40, %v165_v40 }
  0x79   :  { %1949 = vmatprep.subr.bf16.mxu1 %v4823_v43  ;;  %v4895_v43 = vld [vmem:[#allocation2 + $0x170] ss:$20 sps:$4 sm:$0xff]   ;;  %v4973_v40 = vld [vmem:[#allocation2 + $0x6e8] ss:$20 sps:$4 sm:$0xff]  }
  0x7b   :  { %1872 = vmatpush1.bf16.msra.mxu0 %v4824_v47  ;;  %v4903_v47 = vld [vmem:[#allocation2 + $0x14c] ss:$20 sps:$4 sm:$0xff]  }
  0x7c   :  { %1950 = vmatpush1.bf16.msra.mxu1 %v4821_v45  ;;  %1873 = vmatprep.subr.bf16.mxu0 %v4832_v49  ;;  %v4898_v45 = vld [vmem:[#allocation2 + $0x3a0] ss:$20 sps:$4 sm:$0xff]   ;;  %v4901_v49 = vld [vmem:[#allocation2 + $0x148] ss:$20 sps:$4 sm:$0xff]  }
  0x7d   :  { %1951 = vmatprep.subr.bf16.mxu1 %v4829_v48  ;;  %v4906_v48 = vld [vmem:[#allocation2 + $0x37c] ss:$20 sps:$4 sm:$0xff]  }
  0x7f   :  { %1874 = vmatpush1.bf16.msra.mxu0 %v4830_v51  ;;  %v4909_v51 = vld [vmem:[#allocation2 + $0x624] ss:$20 sps:$4 sm:$0xff]  }
  0x80   :  { %1952 = vmatpush1.bf16.msra.mxu1 %v4827_v50  ;;  %1875 = vmatprep.subr.bf16.mxu0 %v4838_v54  ;;  %v4904_v50 = vld [vmem:[#allocation2 + $0x378] ss:$20 sps:$4 sm:$0xff]   ;;  %v4907_v54 = vld [vmem:[#allocation2 + $0x620] ss:$20 sps:$4 sm:$0xff]  }
  0x81   :  { %1953 = vmatprep.subr.bf16.mxu1 %v4835_v52  ;;  %v4912_v52 = vld [vmem:[#allocation2 + $0x354] ss:$20 sps:$4 sm:$0xff]  }
  0x83   :  { %1876 = vmatpush1.bf16.msra.mxu0 %v4836_v56  ;;  %v4915_v56 = vld [vmem:[#allocation2 + $0x5fc] ss:$20 sps:$4 sm:$0xff]  }
  0x84   :  { %1954 = vmatpush1.bf16.msra.mxu1 %v4833_v55  ;;  %1877 = vmatprep.subr.bf16.mxu0 %v4844_v58  ;;  %v4910_v55 = vld [vmem:[#allocation2 + $0x350] ss:$20 sps:$4 sm:$0xff]   ;;  %v4913_v58 = vld [vmem:[#allocation2 + $0x5f8] ss:$20 sps:$4 sm:$0xff]  }
  0x85   :  { %1955 = vmatprep.subr.bf16.mxu1 %v4841_v57  ;;  %v4918_v57 = vld [vmem:[#allocation2 + $0x32c] ss:$20 sps:$4 sm:$0xff]  }
  0x87   :  { %1878 = vmatpush1.bf16.msra.mxu0 %v4842_v63  ;;  %v4922_v63 = vld [vmem:[#allocation2 + $0x300] ss:$20 sps:$4 sm:$0xff]  }
  0x88   :  { %1956 = vmatpush1.bf16.msra.mxu1 %v4839_v62  ;;  %1879 = vmatprep.subr.bf16.mxu0 %v4850_v2  ;;  %v4919_v62 = vld [vmem:[#allocation2 + $0x5d0] ss:$20 sps:$4 sm:$0xff]   ;;  %v4925_v2 = vld [vmem:[#allocation2 + $0x5a8] ss:$20 sps:$4 sm:$0xff]  }
  0x89   :  { %1957 = vmatprep.subr.bf16.mxu1 %v4847_v1  ;;  %v4930_v1 = vld [vmem:[#allocation2 + $0x2dc] ss:$20 sps:$4 sm:$0xff]  }
  0x8b   :  { %1880 = vmatpush2.bf16.msra.mxu0 %v4848_v5  ;;  %v4936_v5 = vld [vmem:[#allocation2 + $0x2b4] ss:$20 sps:$4 sm:$0xff]  }
  0x8c   :  { %1958 = vmatpush1.bf16.msra.mxu1 %v4845_v4  ;;  %1881 = vmatprep.subr.bf16.mxu0 %v4856_v53  ;;  %v4933_v4 = vld [vmem:[#allocation2 + $0x584] ss:$20 sps:$4 sm:$0xff]  }
  0x8d   :  { %1959 = vmatprep.subr.bf16.mxu1 %v4853_v8  ;;  %v4931_v8 = vld [vmem:[#allocation2 + $0x580] ss:$20 sps:$4 sm:$0xff]   ;;  %v4934_v53 = vld [vmem:[#allocation2 + $0x2b0] ss:$20 sps:$4 sm:$0xff]  }
  0x8f   :  { %1882 = vmatpush2.bf16.msra.mxu0 %v4854_v11  ;;  %v4942_v11 = vld [vmem:[#allocation2 + $0x28c] ss:$20 sps:$4 sm:$0xff]  }
  0x90   :  { %1960 = vmatpush1.bf16.msra.mxu1 %v4851_v9  ;;  %1883 = vmatprep.subr.bf16.mxu0 %v4862_v13  ;;  %v4939_v9 = vld [vmem:[#allocation2 + $0x55c] ss:$20 sps:$4 sm:$0xff]  }
  0x91   :  { %1961 = vmatprep.subr.bf16.mxu1 %v4859_v12  ;;  %v4937_v12 = vld [vmem:[#allocation2 + $0x558] ss:$20 sps:$4 sm:$0xff]   ;;  %v4940_v13 = vld [vmem:[#allocation2 + $0x288] ss:$20 sps:$4 sm:$0xff]  }
  0x93   :  { %1884 = vmatpush2.bf16.msra.mxu0 %v4860_v15  ;;  %v4948_v15 = vld [vmem:[#allocation2 + $0x4e4] ss:$20 sps:$4 sm:$0xff]  }
  0x94   :  { %1962 = vmatpush2.bf16.msra.mxu1 %v4857_v14  ;;  %1885 = vmatprep.subr.bf16.mxu0 %v4868_v17  ;;  %v4945_v14 = vld [vmem:[#allocation2 + $0x534] ss:$20 sps:$4 sm:$0xff]  }
  0x95   :  { %1963 = vmatprep.subr.bf16.mxu1 %v4865_v16  ;;  %v4943_v16 = vld [vmem:[#allocation2 + $0x530] ss:$20 sps:$4 sm:$0xff]   ;;  %v4946_v17 = vld [vmem:[#allocation2 + $0x4e0] ss:$20 sps:$4 sm:$0xff]  }
  0x97   :  { %1886 = vmatpush2.bf16.msra.mxu0 %v4866_v19  ;;  %v4954_v19 = vld [vmem:[#allocation2 + $0x4bc] ss:$20 sps:$4 sm:$0xff]  }
  0x98   :  { %1964 = vmatpush2.bf16.msra.mxu1 %v4863_v18  ;;  %1887 = vmatprep.subr.bf16.mxu0 %v4874_v21  ;;  %v4951_v18 = vld [vmem:[#allocation2 + $0x50c] ss:$20 sps:$4 sm:$0xff]  }
  0x99   :  { %1965 = vmatprep.subr.bf16.mxu1 %v4871_v20  ;;  %v4949_v20 = vld [vmem:[#allocation2 + $0x508] ss:$20 sps:$4 sm:$0xff]   ;;  %v4952_v21 = vld [vmem:[#allocation2 + $0x4b8] ss:$20 sps:$4 sm:$0xff]  }
  0x9b   :  { %1888 = vmatpush2.bf16.msra.mxu0 %v4872_v23  ;;  %v4960_v23 = vld [vmem:[#allocation2 + $0x494] ss:$20 sps:$4 sm:$0xff]  }
  0x9c   :  { %1966 = vmatpush2.bf16.msra.mxu1 %v4869_v22  ;;  %1889 = vmatprep.subr.bf16.mxu0 %v4880_v27  ;;  %v4957_v22 = vld [vmem:[#allocation2 + $0x764] ss:$20 sps:$4 sm:$0xff]  }
  0x9d   :  { %1967 = vmatprep.subr.bf16.mxu1 %v4877_v26  ;;  %v4955_v26 = vld [vmem:[#allocation2 + $0x760] ss:$20 sps:$4 sm:$0xff]   ;;  %v4958_v27 = vld [vmem:[#allocation2 + $0x490] ss:$20 sps:$4 sm:$0xff]  }
  0x9f   :  { %1890 = vmatpush2.bf16.msra.mxu0 %v4878_v29  ;;  %v4966_v29 = vld [vmem:[#allocation2 + $0x46c] ss:$20 sps:$4 sm:$0xff]  }
  0xa0   :  { %1968 = vmatpush2.bf16.msra.mxu1 %v4875_v28  ;;  %1891 = vmatprep.subr.bf16.mxu0 %v4886_v31  ;;  %v4963_v28 = vld [vmem:[#allocation2 + $0x73c] ss:$20 sps:$4 sm:$0xff]  }
  0xa1   :  { %1969 = vmatprep.subr.bf16.mxu1 %v4883_v30  ;;  %v4961_v30 = vld [vmem:[#allocation2 + $0x738] ss:$20 sps:$4 sm:$0xff]   ;;  %v4964_v31 = vld [vmem:[#allocation2 + $0x468] ss:$20 sps:$4 sm:$0xff]  }
  0xa3   :  { %1892 = vmatpush2.bf16.msra.mxu0 %v4884_v33  ;;  %v4972_v33 = vld [vmem:[#allocation2 + $0x444] ss:$20 sps:$4 sm:$0xff]  }
  0xa4   :  { %1970 = vmatpush2.bf16.msra.mxu1 %v4881_v32  ;;  %1893 = vmatprep.subr.bf16.mxu0 %v4892_v37  ;;  %v4969_v32 = vld [vmem:[#allocation2 + $0x714] ss:$20 sps:$4 sm:$0xff]  }
  0xa5   :  { %1971 = vmatprep.subr.bf16.mxu1 %v4889_v35  ;;  %v4967_v35 = vld [vmem:[#allocation2 + $0x710] ss:$20 sps:$4 sm:$0xff]   ;;  %v4970_v37 = vld [vmem:[#allocation2 + $0x440] ss:$20 sps:$4 sm:$0xff]  }
  0xa7   :  { %1894 = vmatpush2.bf16.msra.mxu0 %v4890_v39  ;;  %v4978_v39 = vld [vmem:[#allocation2 + $0x41c] ss:$20 sps:$4 sm:$0xff]  }
  0xa8   :  { %1972 = vmatpush2.bf16.msra.mxu1 %v4887_v38  ;;  %1986 = vmatprep.subr.bf16.mxu0 %v4900_v42  ;;  %v4975_v38 = vld [vmem:[#allocation2 + $0x6ec] ss:$20 sps:$4 sm:$0xff]   ;;  %v4981_v42 = vld [vmem:[#allocation2 + $0x6c4] ss:$20 sps:$4 sm:$0xff]  }
  0xa9   :  { %1973 = vmatprep.subr.bf16.mxu1 %v4897_v41  ;;  %v4976_v41 = vld [vmem:[#allocation2 + $0x418] ss:$20 sps:$4 sm:$0xff]  }
  0xaa   :  { %1896 = vmatmul.mubr.bf16.vlgmr.msra.gmra.mxu0 %v5542_v44 }
  0xab   :  { %1987 = vmatpush1.bf16.msra.mxu0 %v4898_v45  ;;  %2018 = vmatprep.mubr.bf16.mxu0 %v5499_v10  ;;  %v4979_v45 = vld [vmem:[#allocation2 + $0x6c0] ss:$20 sps:$4 sm:$0xff]  }
  0xac   :  { %1974 = vmatpush2.bf16.msra.mxu1 %v4895_v43  ;;  %1988 = vmatprep.subr.bf16.mxu0 %v4906_v48  ;;  %v4984_v43 = vld [vmem:[#allocation2 + $0x3f4] ss:$20 sps:$4 sm:$0xff]   ;;  %v4987_v48 = vld [vmem:[#allocation2 + $0x69c] ss:$20 sps:$4 sm:$0xff]  }
  0xad   :  { %1975 = vmatprep.subr.bf16.mxu1 %v4903_v47  ;;  %v4982_v47 = vld [vmem:[#allocation2 + $0x3f0] ss:$20 sps:$4 sm:$0xff]  }
  0xaf   :  { %1989 = vmatpush1.bf16.msra.mxu0 %v4904_v50  ;;  %v4985_v50 = vld [vmem:[#allocation2 + $0x698] ss:$20 sps:$4 sm:$0xff]  }
  0xb0   :  { %1976 = vmatpush2.bf16.msra.mxu1 %v4901_v49  ;;  %1990 = vmatprep.subr.bf16.mxu0 %v4912_v52  ;;  %v4990_v49 = vld [vmem:[#allocation2 + $0x3cc] ss:$20 sps:$4 sm:$0xff]   ;;  %v4993_v52 = vld [vmem:[#allocation2 + $0x674] ss:$20 sps:$4 sm:$0xff]  }
  0xb1   :  { %2027 = vmatprep.subr.bf16.mxu1 %v4909_v51  ;;  %v4988_v51 = vld [vmem:[#allocation2 + $0x3c8] ss:$20 sps:$4 sm:$0xff]  }
  0xb3   :  { %1978 = vmatmul.mubr.bf16.vlgmr.msra.gmra.mxu1 %v5509_v24  ;;  %1991 = vmatpush1.bf16.msra.mxu0 %v4910_v55  ;;  %v4991_v55 = vld [vmem:[#allocation2 + $0x670] ss:$20 sps:$4 sm:$0xff]  }
  0xb4   :  { %2028 = vmatpush1.bf16.msra.mxu1 %v4907_v54  ;;  %1992 = vmatprep.subr.bf16.mxu0 %v4918_v57  ;;  %v4996_v54 = vld [vmem:[#allocation2 + $0x78c] ss:$20 sps:$4 sm:$0xff]  }
  0xb5   :  { %2029 = vmatprep.subr.bf16.mxu1 %v4915_v56  ;;  %2059 = vmatprep.mubr.bf16.mxu1 %v5537_v6  ;;  %v4994_v56 = vld [vmem:[#allocation2 + $0x788] ss:$20 sps:$4 sm:$0xff]   ;;  %v4999_v57 = vld [vmem:[#allocation2 + $0x64c] ss:$20 sps:$4 sm:$0xff]  }
  0xb7   :  { %1993 = vmatpush1.bf16.msra.mxu0 %v4916_v59  ;;  %v4997_v59 = vld [vmem:[#allocation2 + $0x648] ss:$20 sps:$4 sm:$0xff]  }
  0xb8   :  { %2030 = vmatpush1.bf16.msra.mxu1 %v4913_v58  ;;  %1994 = vmatprep.subr.bf16.mxu0 %v4924_v61  ;;  %v5000_v58 = vld [vmem:[#allocation2 + $0x268] ss:$20 sps:$4 sm:$0xff]  }
  0xb9   :  { %2031 = vmatprep.subr.bf16.mxu1 %v4921_v60  ;;  %v5002_v60 = vld [vmem:[#allocation2 + $0x4e8] ss:$20 sps:$4 sm:$0xff]  }
  0xba   :  { %v5001_v61 = vld [vmem:[#allocation2 + $0x128] ss:$20 sps:$4 sm:$0xff]  }
  0xbb   :  { %1995 = vmatpush1.bf16.msra.mxu0 %v4922_v63  ;;  %v5004_v63 = vld [vmem:[#allocation2 + $0x240] ss:$20 sps:$4 sm:$0xff]  }
  0xbc   :  { %2032 = vmatpush1.bf16.msra.mxu1 %v4919_v62  ;;  %1996 = vmatprep.subr.bf16.mxu0 %v4930_v1  ;;  %v5003_v62 = vld [vmem:[#allocation2 + $0x3a8] ss:$20 sps:$4 sm:$0xff]   ;;  %v5005_v1 = vld [vmem:[#allocation2 + $0x100] ss:$20 sps:$4 sm:$0xff]  }
  0xbd   :  { %2033 = vmatprep.subr.bf16.mxu1 %v4927_v0  ;;  %v5006_v0 = vld [vmem:[#allocation2 + $0x4c0] ss:$20 sps:$4 sm:$0xff]  }
  0xbf   :  { %1997 = vmatpush1.bf16.msra.mxu0 %v4928_v3  ;;  %v5008_v3 = vld [vmem:[#allocation2 + $0x218] ss:$20 sps:$4 sm:$0xff]  }
  0xc0   :  { %2034 = vmatpush1.bf16.msra.mxu1 %v4925_v2  ;;  %1998 = vmatprep.subr.bf16.mxu0 %v4936_v5  ;;  %v5007_v2 = vld [vmem:[#allocation2 + $0x380] ss:$20 sps:$4 sm:$0xff]   ;;  %v5009_v5 = vld [vmem:[#allocation2 + $0xd8] ss:$20 sps:$4 sm:$0xff]  }
  0xc1   :  { %2035 = vmatprep.subr.bf16.mxu1 %v4933_v4  ;;  %v5010_v4 = vld [vmem:[#allocation2 + $0x498] ss:$20 sps:$4 sm:$0xff]  }
  0xc3   :  { %1999 = vmatpush1.bf16.msra.mxu0 %v4934_v53  ;;  %v5012_v53 = vld [vmem:[#allocation2 + $0x1f0] ss:$20 sps:$4 sm:$0xff]  }
  0xc4   :  { %2036 = vmatpush1.bf16.msra.mxu1 %v4931_v8  ;;  %2000 = vmatprep.subr.bf16.mxu0 %v4942_v11  ;;  %v5011_v8 = vld [vmem:[#allocation2 + $0x358] ss:$20 sps:$4 sm:$0xff]   ;;  %v5013_v11 = vld [vmem:[#allocation2 + $0xb0] ss:$20 sps:$4 sm:$0xff]  }
  0xc5   :  { %2037 = vmatprep.subr.bf16.mxu1 %v4939_v9  ;;  %v5014_v9 = vld [vmem:[#allocation2 + $0x470] ss:$20 sps:$4 sm:$0xff]  }
  0xc7   :  { %2001 = vmatpush1.bf16.msra.mxu0 %v4940_v13  ;;  %v5016_v13 = vld [vmem:[#allocation2 + $0x1c8] ss:$20 sps:$4 sm:$0xff]  }
  0xc8   :  { %2038 = vmatpush1.bf16.msra.mxu1 %v4937_v12  ;;  %2002 = vmatprep.subr.bf16.mxu0 %v4948_v15  ;;  %v5015_v12 = vld [vmem:[#allocation2 + $0x330] ss:$20 sps:$4 sm:$0xff]   ;;  %v5017_v15 = vld [vmem:[#allocation2 + $0x88] ss:$20 sps:$4 sm:$0xff]  }
  0xc9   :  { %2039 = vmatprep.subr.bf16.mxu1 %v4945_v14  ;;  %v5018_v14 = vld [vmem:[#allocation2 + $0x448] ss:$20 sps:$4 sm:$0xff]  }
  0xcb   :  { %2003 = vmatpush2.bf16.msra.mxu0 %v4946_v17  ;;  %v5021_v17 = vld [vmem:[#allocation2 + $0x60] ss:$20 sps:$4 sm:$0xff]  }
  0xcc   :  { %2040 = vmatpush1.bf16.msra.mxu1 %v4943_v16  ;;  %2004 = vmatprep.subr.bf16.mxu0 %v4954_v19  ;;  %v5022_v16 = vld [vmem:[#allocation2 + $0x420] ss:$20 sps:$4 sm:$0xff]   ;;  %v5024_v19 = vld [vmem:[#allocation2 + $0x178] ss:$20 sps:$4 sm:$0xff]  }
  0xcd   :  { %2041 = vmatprep.subr.bf16.mxu1 %v4951_v18  ;;  %v5023_v18 = vld [vmem:[#allocation2 + $0x2e0] ss:$20 sps:$4 sm:$0xff]  }
  0xcf   :  { %2005 = vmatpush2.bf16.msra.mxu0 %v4952_v21  ;;  %v5025_v21 = vld [vmem:[#allocation2 + $0x38] ss:$20 sps:$4 sm:$0xff]  }
  0xd0   :  { %2042 = vmatpush1.bf16.msra.mxu1 %v4949_v20  ;;  %2006 = vmatprep.subr.bf16.mxu0 %v4960_v23  ;;  %v5026_v20 = vld [vmem:[#allocation2 + $0x3f8] ss:$20 sps:$4 sm:$0xff]   ;;  %v5028_v23 = vld [vmem:[#allocation2 + $0x150] ss:$20 sps:$4 sm:$0xff]  }
  0xd1   :  { %2043 = vmatprep.subr.bf16.mxu1 %v4957_v22  ;;  %v5027_v22 = vld [vmem:[#allocation2 + $0x2b8] ss:$20 sps:$4 sm:$0xff]  }
  0xd3   :  { %2007 = vmatpush2.bf16.msra.mxu0 %v4958_v27  ;;  %v5029_v27 = vld [vmem:[#allocation2 + $0x10] ss:$20 sps:$4 sm:$0xff]  }
  0xd4   :  { %2044 = vmatpush2.bf16.msra.mxu1 %v4955_v26  ;;  %2008 = vmatprep.subr.bf16.mxu0 %v4966_v29  ;;  %v5030_v26 = vld [vmem:[#allocation2 + $0x3d0] ss:$20 sps:$4 sm:$0xff]   ;;  %v5032_v29 = vld [vmem:[#allocation2 + $0x768] ss:$20 sps:$4 sm:$0xff]  }
  0xd5   :  { %2045 = vmatprep.subr.bf16.mxu1 %v4963_v28  ;;  %v5031_v28 = vld [vmem:[#allocation2 + $0x290] ss:$20 sps:$4 sm:$0xff]  }
  0xd7   :  { %2009 = vmatpush2.bf16.msra.mxu0 %v4964_v31  ;;  %v5048_v31 = vld [vmem:[#allocation2 + $0x790] ss:$20 sps:$4 sm:$0xff]  }
  0xd8   :  { %2046 = vmatpush2.bf16.msra.mxu1 %v4961_v30  ;;  %2010 = vmatprep.subr.bf16.mxu0 %v4972_v33  ;;  %v5033_v30 = vld [vmem:[#allocation2 + $0x628] ss:$20 sps:$4 sm:$0xff]   ;;  %v5051_v33 = vld [vmem:[#allocation5 + $0xac] ss:$12 sps:$4 sm:$0xff]  }
  0xd9   :  { %2047 = vmatprep.subr.bf16.mxu1 %v4969_v32  ;;  %v5034_v32 = vld [vmem:[#allocation2 + $0x740] ss:$20 sps:$4 sm:$0xff]  }
  0xdb   :  { %2011 = vmatpush2.bf16.msra.mxu0 %v4970_v37  ;;  %v5035_v37 = vld [vmem:[#allocation2 + $0x600] ss:$20 sps:$4 sm:$0xff]  }
  0xdc   :  { %2048 = vmatpush2.bf16.msra.mxu1 %v4967_v35  ;;  %2012 = vmatprep.subr.bf16.mxu0 %v4978_v39  ;;  %v5402_v35 = vmov 0.0   ;;  %v5037_v39 = vld [vmem:[#allocation2 + $0x5d8] ss:$20 sps:$4 sm:$0xff]  }
  0xdd   :  { %2049 = vmatprep.subr.bf16.mxu1 %v4975_v38  ;;  %v5036_v38 = vld [vmem:[#allocation2 + $0x718] ss:$20 sps:$4 sm:$0xff]  }
  0xdf   :  { %2013 = vmatpush2.bf16.msra.mxu0 %v4976_v41  ;;  %v5038_v41 = vld [vmem:[#allocation2 + $0x6f0] ss:$20 sps:$4 sm:$0xff]  }
  0xe0   :  { %2050 = vmatpush2.bf16.msra.mxu1 %v4973_v40  ;;  %2014 = vmatprep.subr.bf16.mxu0 %v4984_v43  ;;  %v5049_v40 = vld [vmem:[#allocation5 + $0xa8] ss:$12 sps:$4 sm:$0xff]   ;;  %v5052_v43 = vld [vmem:[#allocation5 + $0x90] ss:$12 sps:$4 sm:$0xff]  }
  0xe1   :  { %2051 = vmatprep.subr.bf16.mxu1 %v4981_v42  ;;  %v5054_v42 = vld [vmem:[#allocation5 + $0x94] ss:$12 sps:$4 sm:$0xff]  }
  0xe3   :  { %2015 = vmatpush2.bf16.msra.mxu0 %v4982_v47  ;;  %v5055_v47 = vld [vmem:[#allocation5 + $0x78] ss:$12 sps:$4 sm:$0xff]  }
  0xe4   :  { %2052 = vmatpush2.bf16.msra.mxu1 %v4979_v45  ;;  %2016 = vmatprep.subr.bf16.mxu0 %v4990_v49  ;;  %v5057_v45 = vld [vmem:[#allocation5 + $0x7c] ss:$12 sps:$4 sm:$0xff]   ;;  %v5060_v49 = vld [vmem:[#allocation5 + $0x64] ss:$12 sps:$4 sm:$0xff]  }
  0xe5   :  { %2053 = vmatprep.subr.bf16.mxu1 %v4987_v48  ;;  %v5042_v48 = vld [vmem:[#allocation2 + $0x6a0] ss:$20 sps:$4 sm:$0xff]  }
  0xe7   :  { %2017 = vmatpush2.bf16.msra.mxu0 %v4988_v51  ;;  %v5058_v51 = vld [vmem:[#allocation5 + $0x60] ss:$12 sps:$4 sm:$0xff]  }
  0xe8   :  { %2054 = vmatpush2.bf16.msra.mxu1 %v4985_v50  ;;  %2082 = vmatprep.subr.bf16.mxu0 %v4996_v54  ;;  %v5043_v50 = vld [vmem:[#allocation2 + $0x560] ss:$20 sps:$4 sm:$0xff]  }
  0xe9   :  { %2055 = vmatprep.subr.bf16.mxu1 %v4993_v52  ;;  %v5044_v52 = vld [vmem:[#allocation2 + $0x678] ss:$20 sps:$4 sm:$0xff]   ;;  %v5063_v54 = vld [vmem:[#allocation5 + $0x4c] ss:$12 sps:$4 sm:$0xff]  }
  0xea   :  { %2019 = vmatmul.mubr.bf16.vlgmr.msra.gmra.mxu0 %v5511_v25 }
  0xeb   :  { %2083 = vmatpush1.bf16.msra.mxu0 %v4994_v56  ;;  %2100 = vmatprep.mubr.bf16.mxu0 %v5401_v34  ;;  %v5046_v56 = vld [vmem:[#allocation2 + $0x650] ss:$20 sps:$4 sm:$0xff]  }
  0xec   :  { %2056 = vmatpush2.bf16.msra.mxu1 %v4991_v55  ;;  %4480 = vmatprep.subr.bf16.mxu0 %v5000_v58  ;;  %v5061_v55 = vld [vmem:[#allocation5 + $0x48] ss:$12 sps:$4 sm:$0xff]  }
  0xed   :  { %2057 = vmatprep.subr.bf16.mxu1 %v4999_v57  ;;  %v5066_v57 = vld [vmem:[#allocation5 + $0x34] ss:$12 sps:$4 sm:$0xff]   ;;  %v5047_v58 = vld [vmem:[#allocation2 + $0x510] ss:$20 sps:$4 sm:$0xff]  }
  0xf0   :  { %2058 = vmatpush2.bf16.msra.mxu1 %v4997_v59  ;;  %v5064_v59 = vld [vmem:[#allocation5 + $0x30] ss:$12 sps:$4 sm:$0xff]  }
  0xf1   :  { %4502 = vmatprep.subr.bf16.mxu1 %v5002_v60 }
  0xf2   :  { %4284 = vmatmul.mubr.msk.bf16.vlgmr.msra.gmra.mxu0 %vm1777_vm0, %v5518_v36 }
  0xf3   :  { %2060 = vmatmul.mubr.bf16.vlgmr.msra.gmra.mxu1 %v5542_v44  ;;  %4481 = vmatpush3.bf16.msra.mxu0 %v5001_v61 }
  0xf4   :  { %4503 = vmatpush3.bf16.msra.mxu1 %v5003_v62  ;;  %4482 = vmatprep.subr.bf16.mxu0 %v5004_v63  ;;  %v5069_v62 = vld [vmem:[#allocation5 + $0x1c] ss:$12 sps:$4 sm:$0xff]  }
  0xf5   :  { %4504 = vmatprep.subr.bf16.mxu1 %v5006_v0  ;;  %2141 = vmatprep.mubr.bf16.mxu0 %v5497_v7  ;;  %v5019_v7 = vld [vmem:[#allocation2 + $0x308] ss:$20 sps:$4 sm:$0xff]  }
  0xf6   :  { %2181 = vmatprep.mubr.bf16.mxu1 %v5499_v10  ;;  %v5020_v10 = vld [vmem:[#allocation2 + $0x1a0] ss:$20 sps:$4 sm:$0xff]  }
  0xf7   :  { %4483 = vmatpush3.bf16.msra.mxu0 %v5005_v1  ;;  %v5099_v1 = vld [vmem:[#allocation5 + $0x22c] ss:$12 sps:$4 sm:$0xff]  }
  0xf8   :  { %4505 = vmatpush3.bf16.msra.mxu1 %v5007_v2  ;;  %4484 = vmatprep.subr.bf16.mxu0 %v5008_v3  ;;  %v5067_v2 = vld [vmem:[#allocation5 + $0x18] ss:$12 sps:$4 sm:$0xff]  }
  0xf9   :  { %4506 = vmatprep.subr.bf16.mxu1 %v5010_v4 }
  0xfb   :  { %4485 = vmatpush3.bf16.msra.mxu0 %v5009_v5  ;;  %v5072_v5 = vld [vmem:[#allocation5 + $0x4] ss:$12 sps:$4 sm:$0xff]  }
  0xfc   :  { %4507 = vmatpush3.bf16.msra.mxu1 %v5011_v8  ;;  %4486 = vmatprep.subr.bf16.mxu0 %v5012_v53  ;;  %v5097_v8 = vld [vmem:[#allocation5 + $0x228] ss:$12 sps:$4 sm:$0xff]  }
  0xfd   :  { %4508 = vmatprep.subr.bf16.mxu1 %v5014_v9 }
  0xff   :  { %4487 = vmatpush3.bf16.msra.mxu0 %v5013_v11  ;;  %v5102_v11 = vld [vmem:[#allocation5 + $0x214] ss:$12 sps:$4 sm:$0xff]  }
 0x100   :  { %4509 = vmatpush3.bf16.msra.mxu1 %v5015_v12  ;;  %4488 = vmatprep.subr.bf16.mxu0 %v5016_v13  ;;  %v5070_v12 = vld [vmem:[#allocation5] ss:$12 sps:$4 sm:$0xff]  }
 0x101   :  { %4510 = vmatprep.subr.bf16.mxu1 %v5018_v14  ;;  %v5075_v14 = vld [vmem:[#allocation5 + $0x16c] ss:$12 sps:$4 sm:$0xff]  }
 0x103   :  { %4489 = vmatpush3.bf16.msra.mxu0 %v5017_v15  ;;  %v5100_v15 = vld [vmem:[#allocation5 + $0x210] ss:$12 sps:$4 sm:$0xff]  }
 0x104   :  { %4511 = vmatpush3.bf16.msra.mxu1 %v5019_v7  ;;  %4490 = vmatprep.subr.bf16.mxu0 %v5020_v10  ;;  %v5105_v10 = vld [vmem:[#allocation5 + $0x1fc] ss:$12 sps:$4 sm:$0xff]  }
 0x105   :  { %4512 = vmatprep.subr.bf16.mxu1 %v5022_v16  ;;  %v5073_v16 = vld [vmem:[#allocation5 + $0x168] ss:$12 sps:$4 sm:$0xff]  }
 0x107   :  { %4491 = vmatpush3.bf16.msra.mxu0 %v5021_v17 }
 0x108   :  { %4513 = vmatpush3.bf16.msra.mxu1 %v5023_v18  ;;  %4492 = vmatprep.subr.bf16.mxu0 %v5024_v19  ;;  %v5078_v18 = vld [vmem:[#allocation5 + $0x154] ss:$12 sps:$4 sm:$0xff]   ;;  %v5103_v19 = vld [vmem:[#allocation5 + $0x1f8] ss:$12 sps:$4 sm:$0xff]  }
 0x109   :  { %4514 = vmatprep.subr.bf16.mxu1 %v5026_v20 }
 0x10b   :  { %4493 = vmatpush3.bf16.msra.mxu0 %v5025_v21  ;;  %v5076_v21 = vld [vmem:[#allocation5 + $0x150] ss:$12 sps:$4 sm:$0xff]  }
 0x10c   :  { %4515 = vmatpush3.bf16.msra.mxu1 %v5027_v22  ;;  %4494 = vmatprep.subr.bf16.mxu0 %v5028_v23  ;;  %v5081_v22 = vld [vmem:[#allocation5 + $0x13c] ss:$12 sps:$4 sm:$0xff]   ;;  %v5106_v23 = vld [vmem:[#allocation5 + $0x1e0] ss:$12 sps:$4 sm:$0xff]  }
 0x10d   :  { %4516 = vmatprep.subr.bf16.mxu1 %v5030_v26  ;;  %v5111_v26 = vld [vmem:[#allocation5 + $0x1cc] ss:$12 sps:$4 sm:$0xff]  }
 0x10f   :  { %4495 = vmatpush3.bf16.msra.mxu0 %v5029_v27  ;;  %v5079_v27 = vld [vmem:[#allocation5 + $0x138] ss:$12 sps:$4 sm:$0xff]  }
 0x110   :  { %4517 = vmatpush3.bf16.msra.mxu1 %v5031_v28  ;;  %4524 = vmatprep.subr.bf16.mxu0 %v5032_v29  ;;  %v5084_v28 = vld [vmem:[#allocation5 + $0x124] ss:$12 sps:$4 sm:$0xff]   ;;  %v5109_v29 = vld [vmem:[#allocation5 + $0x1c8] ss:$12 sps:$4 sm:$0xff]  }
 0x111   :  { %4632 = vmatprep.subr.bf16.mxu1 %v5402_v35 }
 0x112   :  { %2142 = vmatmul.mubr.bf16.vlgmr.msra.gmra.mxu0 %v5509_v24  ;;  %v5039_v24 = vld [vmem:[#allocation2 + $0x5b0] ss:$20 sps:$4 sm:$0xff]  }
 0x113   :  { %2182 = vmatmul.mubr.bf16.vlgmr.msra.gmra.mxu1 %v5511_v25  ;;  %4525 = vmatpush3.bf16.msra.mxu0 %v5033_v30  ;;  %v5040_v25 = vld [vmem:[#allocation2 + $0x6c8] ss:$20 sps:$4 sm:$0xff]  }
 0x114   :  { %4633 = vmatpush3.bf16.msra.mxu1 %v5048_v31  ;;  %4526 = vmatprep.subr.bf16.mxu0 %v5034_v32  ;;  %v5114_v30 = vld [vmem:[#allocation5 + $0x1b4] ss:$12 sps:$4 sm:$0xff]   ;;  %v5087_v32 = vld [vmem:[#allocation5 + $0x10c] ss:$12 sps:$4 sm:$0xff]  }
 0x115   :  { %2221 = vmatprep.mubr.bf16.mxu0 %v5537_v6  ;;  %4634 = vmatprep.mubr.msk.bf16.mxu1 %vm5403_vm1, %v5402_v35  ;;  %v5041_v6 = vld [vmem:[#allocation2 + $0x588] ss:$20 sps:$4 sm:$0xff]  }
 0x116   :  { %3096 = vmatprep.subr.bf16.mxu1 %v5051_v33  ;;  %v5082_v31 = vld [vmem:[#allocation5 + $0x120] ss:$12 sps:$4 sm:$0xff]   ;;  %v5112_v33 = vld [vmem:[#allocation5 + $0x1b0] ss:$12 sps:$4 sm:$0xff]  }
 0x117   :  { %4527 = vmatpush3.bf16.msra.mxu0 %v5035_v37  ;;  %v5117_v37 = vld [vmem:[#allocation5 + $0x19c] ss:$12 sps:$4 sm:$0xff]  }
 0x118   :  { %4528 = vmatprep.subr.bf16.mxu0 %v5036_v38  ;;  %v5085_v38 = vld [vmem:[#allocation5 + $0x108] ss:$12 sps:$4 sm:$0xff]  }
 0x11b   :  { %4635 = vmatmul.mubr.msk.bf16.vlgmr.msra.gmra.mxu1 %vm1777_vm0, %v5518_v36  ;;  %4529 = vmatpush3.bf16.msra.mxu0 %v5037_v39  ;;  %v5045_v36 = vld [vmem:[#allocation2 + $0x538] ss:$20 sps:$4 sm:$0xff]   ;;  %v5090_v39 = vld [vmem:[#allocation5 + $0xf4] ss:$12 sps:$4 sm:$0xff]  }
 0x11c   :  { %3097 = vmatpush1.bf16.msra.mxu1 %v5049_v40  ;;  %4530 = vmatprep.subr.bf16.mxu0 %v5038_v41  ;;  %v5115_v40 = vld [vmem:[#allocation5 + $0x198] ss:$12 sps:$4 sm:$0xff]  }
 0x11d   :  { %3098 = vmatprep.subr.bf16.mxu1 %v5054_v42  ;;  %v5120_v41 = vld [vmem:[#allocation5 + $0x184] ss:$12 sps:$4 sm:$0xff]  }
 0x11e   :  { %v5088_v42 = vld [vmem:[#allocation5 + $0xf0] ss:$12 sps:$4 sm:$0xff]  }
 0x11f   :  { %4531 = vmatpush3.bf16.msra.mxu0 %v5039_v24  ;;  %v5093_v24 = vld [vmem:[#allocation5 + $0xdc] ss:$12 sps:$4 sm:$0xff]  }
 0x120   :  { %3099 = vmatpush1.bf16.msra.mxu1 %v5052_v43  ;;  %4532 = vmatprep.subr.bf16.mxu0 %v5040_v25  ;;  %v5118_v43 = vld [vmem:[#allocation5 + $0x180] ss:$12 sps:$4 sm:$0xff]  }
 0x121   :  { %3100 = vmatprep.subr.bf16.mxu1 %v5057_v45  ;;  %v5123_v25 = vld [vmem:[#allocation5 + $0x2ec] ss:$12 sps:$4 sm:$0xff]  }
 0x122   :  { %v5091_v45 = vld [vmem:[#allocation5 + $0xd8] ss:$12 sps:$4 sm:$0xff]  }
 0x123   :  { %4533 = vmatpush3.bf16.msra.mxu0 %v5041_v6  ;;  %v5121_v6 = vld [vmem:[#allocation5 + $0x2e8] ss:$12 sps:$4 sm:$0xff]  }
 0x124   :  { %3101 = vmatpush1.bf16.msra.mxu1 %v5055_v47  ;;  %4534 = vmatprep.subr.bf16.mxu0 %v5042_v48  ;;  %v5096_v47 = vld [vmem:[#allocation5 + $0xc4] ss:$12 sps:$4 sm:$0xff]   ;;  %v5126_v48 = vld [vmem:[#allocation5 + $0x2d4] ss:$12 sps:$4 sm:$0xff]  }
 0x125   :  { %3102 = vmatprep.subr.bf16.mxu1 %v5060_v49  ;;  %v5094_v49 = vld [vmem:[#allocation5 + $0xc0] ss:$12 sps:$4 sm:$0xff]  }
 0x127   :  { %4535 = vmatpush3.bf16.msra.mxu0 %v5043_v50  ;;  %v5124_v50 = vld [vmem:[#allocation5 + $0x2d0] ss:$12 sps:$4 sm:$0xff]  }
 0x128   :  { %3103 = vmatpush1.bf16.msra.mxu1 %v5058_v51  ;;  %4536 = vmatprep.subr.bf16.mxu0 %v5044_v52  ;;  %v5129_v51 = vld [vmem:[#allocation5 + $0x2bc] ss:$12 sps:$4 sm:$0xff]   ;;  %v5127_v52 = vld [vmem:[#allocation5 + $0x2b8] ss:$12 sps:$4 sm:$0xff]  }
 0x129   :  { %3104 = vmatprep.subr.bf16.mxu1 %v5063_v54  ;;  %v5132_v54 = vld [vmem:[#allocation5 + $0x2a4] ss:$12 sps:$4 sm:$0xff]  }
 0x12a   :  { %v5563_v60 = vpop.f32.mrf.mxu0 }
 0x12b   :  { %v5565_v61 = vpop.f32.mrf.mxu1  ;;  %4537 = vmatpush3.bf16.msra.mxu0 %v5045_v36  ;;  %v5130_v36 = vld [vmem:[#allocation5 + $0x2a0] ss:$12 sps:$4 sm:$0xff]  }
 0x12c   :  { %3105 = vmatpush1.bf16.msra.mxu1 %v5061_v55  ;;  %v5567_v63 = vpop.f32.mrf.mxu0  ;;  %4538 = vmatprep.subr.bf16.mxu0 %v5046_v56  ;;  %v5135_v55 = vld [vmem:[#allocation5 + $0x28c] ss:$12 sps:$4 sm:$0xff]   ;;  %v5577_v56 = vsub.s32 0, %v5476_v46 }
 0x12d   :  { %v5569_v0 = vpop.f32.mrf.mxu1  ;;  %3106 = vmatprep.subr.bf16.mxu1 %v5066_v57  ;;  %v5163_v57 = vld [vmem:[#allocation5 + $0x3ac] ss:$12 sps:$4 sm:$0xff]  }
 0x12e   :  { %v1819_v3 = vpop.f32.mrf.mxu0 }
 0x12f   :  { %v1860_v4 = vpop.f32.mrf.mxu1  ;;  %4539 = vmatpush3.bf16.msra.mxu0 %v5047_v58  ;;  %v5582_v58 = vld [vmem:[%s5744_s2] sm:$0x1f] }
 0x130   :  { %3107 = vmatpush1.bf16.msra.mxu1 %v5064_v59  ;;  %v1820_v53 = vpop.f32.mrf.mxu0  ;;  %3137 = vmatprep.subr.bf16.mxu0 %v5099_v1  ;;  %v5585_v59 = vsub.s32 1, %v5476_v46  ;;  %v5138_v1 = vld [vmem:[#allocation5 + $0x274] ss:$12 sps:$4 sm:$0xff]   ;;  %v5136_v4 = vld [vmem:[#allocation5 + $0x270] ss:$12 sps:$4 sm:$0xff]  }
 0x131   :  { %v1861_v9 = vpop.f32.mrf.mxu1  ;;  %3108 = vmatprep.subr.bf16.mxu1 %v5069_v62  ;;  %v5133_v62 = vld [vmem:[#allocation5 + $0x288] ss:$12 sps:$4 sm:$0xff]  }
 0x132   :  { %2222 = vmatmul.mubr.bf16.vlgmr.msra.gmra.mxu0 %v5542_v44  ;;  %v5108_v44 = vld [vmem:[#allocation5 + $0x1e4] ss:$12 sps:$4 sm:$0xff]   ;;  %v485_v3 = vrot.slane %v5582_v58, %v5585_v59 }
 0x133   :  { %v5572_v13 = vpop.f32.mrf.mxu1  ;;  %3138 = vmatpush1.bf16.msra.mxu0 %v5097_v8  ;;  %v5139_v9 = vld [vmem:[#allocation5 + $0x258] ss:$12 sps:$4 sm:$0xff]  }
 0x134   :  { %3109 = vmatpush1.bf16.msra.mxu1 %v5067_v2  ;;  %3139 = vmatprep.subr.bf16.mxu0 %v5102_v11  ;;  %v481_v2 = vrot.slane %v5582_v58, %v5577_v56  ;;  %v1818_v53 = vadd.f32 %v5567_v63, %v485_v3  ;;  %v5144_v11 = vld [vmem:[#allocation5 + $0x244] ss:$12 sps:$4 sm:$0xff]  }
 0x135   :  { %v5574_v7 = vpop.f32.mrf.mxu1  ;;  %3110 = vmatprep.subr.bf16.mxu1 %v5072_v5  ;;  %v5141_v5 = vld [vmem:[#allocation5 + $0x25c] ss:$12 sps:$4 sm:$0xff]  }
 0x136   :  { %v1816_v8 = vadd.f32 %v5563_v60, %v481_v2 }
 0x137   :  { %v1942_v17 = vpop.f32.mrf.mxu1  ;;  %3140 = vmatpush1.bf16.msra.mxu0 %v5100_v15  ;;  %v1859_v15 = vadd.f32 %v5569_v0, %v1818_v53  ;;  %v5161_v0 = vld [vmem:[#allocation5 + $0x3a8] ss:$12 sps:$4 sm:$0xff]  }
 0x138   :  { %3111 = vmatpush1.bf16.msra.mxu1 %v5070_v12  ;;  %3141 = vmatprep.subr.bf16.mxu0 %v5105_v10  ;;  %v1857_v12 = vadd.f32 %v5565_v61, %v1816_v8 }
 0x139   :  { %v1943_v20 = vpop.f32.mrf.mxu1  ;;  %3112 = vmatprep.subr.bf16.mxu1 %v5075_v14 }
 0x13b   :  { %3142 = vmatpush1.bf16.msra.mxu0 %v5103_v19 }
 0x13c   :  { %3113 = vmatpush2.bf16.msra.mxu1 %v5073_v16  ;;  %3143 = vmatprep.subr.bf16.mxu0 %v5108_v44  ;;  %v5142_v16 = vld [vmem:[#allocation5 + $0x240] ss:$12 sps:$4 sm:$0xff]  }
 0x13d   :  { %3114 = vmatprep.subr.bf16.mxu1 %v5078_v18  ;;  %v5145_v18 = vld [vmem:[#allocation5 + $0x170] ss:$12 sps:$4 sm:$0xff]  }
 0x13f   :  { %3144 = vmatpush1.bf16.msra.mxu0 %v5106_v23 }
 0x140   :  { %3115 = vmatpush2.bf16.msra.mxu1 %v5076_v21  ;;  %3145 = vmatprep.subr.bf16.mxu0 %v5111_v26 }
 0x141   :  { %3116 = vmatprep.subr.bf16.mxu1 %v5081_v22 }
 0x143   :  { %3146 = vmatpush1.bf16.msra.mxu0 %v5109_v29 }
 0x144   :  { %3117 = vmatpush2.bf16.msra.mxu1 %v5079_v27  ;;  %3147 = vmatprep.subr.bf16.mxu0 %v5114_v30  ;;  %v5171_v30 = vld [vmem:[#allocation5 + $0x37c] ss:$12 sps:$4 sm:$0xff]  }
 0x145   :  { %3118 = vmatprep.subr.bf16.mxu1 %v5084_v28  ;;  %v5167_v28 = vld [vmem:[#allocation5 + $0x394] ss:$12 sps:$4 sm:$0xff]  }
 0x147   :  { %3148 = vmatpush1.bf16.msra.mxu0 %v5112_v33  ;;  %v5173_v33 = vld [vmem:[#allocation5 + $0x360] ss:$12 sps:$4 sm:$0xff]  }
 0x148   :  { %3119 = vmatpush2.bf16.msra.mxu1 %v5082_v31  ;;  %3149 = vmatprep.subr.bf16.mxu0 %v5117_v37  ;;  %v5169_v31 = vld [vmem:[#allocation5 + $0x378] ss:$12 sps:$4 sm:$0xff]  }
 0x149   :  { %3120 = vmatprep.subr.bf16.mxu1 %v5087_v32  ;;  %v5175_v32 = vld [vmem:[#allocation5 + $0x364] ss:$12 sps:$4 sm:$0xff]   ;;  %v5179_v37 = vld [vmem:[#allocation5 + $0x34c] ss:$12 sps:$4 sm:$0xff]  }
 0x14b   :  { %3150 = vmatpush1.bf16.msra.mxu0 %v5115_v40  ;;  %v5181_v40 = vld [vmem:[#allocation5 + $0x330] ss:$12 sps:$4 sm:$0xff]  }
 0x14c   :  { %3121 = vmatpush2.bf16.msra.mxu1 %v5085_v38  ;;  %3151 = vmatprep.subr.bf16.mxu0 %v5120_v41  ;;  %v5177_v38 = vld [vmem:[#allocation5 + $0x348] ss:$12 sps:$4 sm:$0xff]  }
 0x14d   :  { %3122 = vmatprep.subr.bf16.mxu1 %v5090_v39  ;;  %v5183_v39 = vld [vmem:[#allocation5 + $0x334] ss:$12 sps:$4 sm:$0xff]   ;;  %v5187_v41 = vld [vmem:[#allocation5 + $0x31c] ss:$12 sps:$4 sm:$0xff]  }
 0x14f   :  { %3152 = vmatpush1.bf16.msra.mxu0 %v5118_v43  ;;  %v5189_v43 = vld [vmem:[#allocation5 + $0x300] ss:$12 sps:$4 sm:$0xff]  }
 0x150   :  { %3123 = vmatpush2.bf16.msra.mxu1 %v5088_v42  ;;  %3153 = vmatprep.subr.bf16.mxu0 %v5123_v25  ;;  %v5185_v42 = vld [vmem:[#allocation5 + $0x318] ss:$12 sps:$4 sm:$0xff]   ;;  %v5193_v25 = vld [vmem:[#allocation5 + $0x2f0] ss:$12 sps:$4 sm:$0xff]  }
 0x151   :  { %3124 = vmatprep.subr.bf16.mxu1 %v5093_v24  ;;  %v5191_v24 = vld [vmem:[#allocation5 + $0x304] ss:$12 sps:$4 sm:$0xff]  }
 0x153   :  { %3154 = vmatpush2.bf16.msra.mxu0 %v5121_v6  ;;  %v492_v6 = vsub.s32 3, %v5476_v46 }
 0x154   :  { %3125 = vmatpush2.bf16.msra.mxu1 %v5091_v45  ;;  %3155 = vmatprep.subr.bf16.mxu0 %v5126_v48  ;;  %v488_v45 = vsub.s32 2, %v5476_v46 }
 0x155   :  { %3126 = vmatprep.subr.bf16.mxu1 %v5096_v47 }
 0x156   :  { %v489_v48 = vrot.slane %v5582_v58, %v488_v45 }
 0x157   :  { %3156 = vmatpush2.bf16.msra.mxu0 %v5124_v50  ;;  %v493_v50 = vrot.slane %v5582_v58, %v492_v6  ;;  %v5172_v6 = vld [vmem:[#allocation5 + $0x380] ss:$12 sps:$4 sm:$0xff]  }
 0x158   :  { %3127 = vmatpush2.bf16.msra.mxu1 %v5094_v49  ;;  %3157 = vmatprep.subr.bf16.mxu0 %v5129_v51 }
 0x159   :  { %3178 = vmatprep.subr.bf16.mxu1 %v5163_v57 }
 0x15b   :  { %3158 = vmatpush2.bf16.msra.mxu0 %v5127_v52 }
 0x15c   :  { %3159 = vmatprep.subr.bf16.mxu0 %v5132_v54 }
 0x15f   :  { %3160 = vmatpush2.bf16.msra.mxu0 %v5130_v36 }
 0x160   :  { %3161 = vmatprep.subr.bf16.mxu0 %v5135_v55 }
 0x163   :  { %3162 = vmatpush2.bf16.msra.mxu0 %v5133_v62 }
 0x164   :  { %3163 = vmatprep.subr.bf16.mxu0 %v5138_v1 }
 0x167   :  { %3164 = vmatpush2.bf16.msra.mxu0 %v5136_v4 }
 0x168   :  { %3165 = vmatprep.subr.bf16.mxu0 %v5141_v5 }
 0x16a   :  { %v1897_v14 = vpop.f32.mrf.mxu0 }
 0x16b   :  { %v1898_v10 = vadd.f32 %v1897_v14, %v1857_v12  ;;  %3166 = vmatpush2.bf16.msra.mxu0 %v5139_v9 }
 0x16c   :  { %v1899_v17 = vpop.f32.mrf.mxu0  ;;  %3167 = vmatprep.subr.bf16.mxu0 %v5144_v11 }
 0x16d   :  { %v1939_v19 = vadd.f32 %v5572_v13, %v1898_v10  ;;  %v1900_v60 = vadd.f32 %v1899_v17, %v1859_v15  ;;  %v5146_v17 = vld [vmem:[#allocation5 + $0xb0] ss:$12 sps:$4 sm:$0xff]  }
 0x16e   :  { %v1901_v20 = vpop.f32.mrf.mxu0 }
 0x16f   :  { %v1941_v63 = vadd.f32 %v5574_v7, %v1900_v60  ;;  %3168 = vmatpush2.bf16.msra.mxu0 %v5142_v16  ;;  %v2269_v44 = vmax.f32 %v1939_v19, 0.0  ;;  %v5165_v7 = vld [vmem:[#allocation5 + $0x390] ss:$12 sps:$4 sm:$0xff]   ;;  %v5147_v19 = vld [vmem:[#allocation5 + $0x158] ss:$12 sps:$4 sm:$0xff]  }
 0x170   :  { %v1902_v21 = vpop.f32.mrf.mxu0  ;;  %4548 = vmatprep.subr.bf16.mxu0 %v5145_v18  ;;  %v5148_v60 = vld [vmem:[#allocation5 + $0x98] ss:$12 sps:$4 sm:$0xff]   ;;  %v5149_v20 = vld [vmem:[#allocation5 + $0x140] ss:$12 sps:$4 sm:$0xff]  }
 0x171   :  { %v2270_v61 = vmax.f32 %v1941_v63, 0.0  ;;  %v5599_v26 = vpack.c.bf16 %v2269_v44, %v2269_v44  ;;  %v5150_v63 = vld [vmem:[#allocation5 + $0x80] ss:$12 sps:$4 sm:$0xff]   ;;  %v5151_v44 = vld [vmem:[#allocation5 + $0x128] ss:$12 sps:$4 sm:$0xff]  }
 0x172   :  { %v5152_v21 = vld [vmem:[#allocation5 + $0x68] ss:$12 sps:$4 sm:$0xff]  }
 0x173   :  { %v1979_v22 = vpop.f32.mrf.mxu1  ;;  %v5597_v23 = vpack.c.bf16 %v2270_v61, %v2270_v61  ;;  %v5153_v61 = vld [vmem:[#allocation5 + $0x110] ss:$12 sps:$4 sm:$0xff]  }
 0x174   :  { %v1980_v52 = vadd.f32 %v1979_v22, %v489_v48  ;;  %v5154_v22 = vld [vmem:[#allocation5 + $0x50] ss:$12 sps:$4 sm:$0xff]   ;;  %v496_v48 = vsub.s32 4, %v5476_v46 }
 0x175   :  { %v1981_v27 = vpop.f32.mrf.mxu1  ;;  %3128 = vmatprep.mubr.bf16.mxu1 %v5597_v23  ;;  %v5282_v46 = vld [vmem:[%s5749_s7 + $0x38] sm:$0xff]  }
 0x176   :  { %3129 = vmatmul.mubr.bf16.vlgmr.msra.gmra.mxu1 %v5599_v26  ;;  %v1982_v36 = vadd.f32 %v1981_v27, %v493_v50  ;;  %v5156_v27 = vld [vmem:[#allocation5 + $0x38] ss:$12 sps:$4 sm:$0xff]  }
 0x177   :  { %v1983_v13 = vpop.f32.mrf.mxu1  ;;  %3179 = vmatpush1.bf16.msra.mxu1 %v5161_v0  ;;  %3210 = vmatprep.mubr.bf16.mxu1 %v5401_v34  ;;  %v5155_v0 = vld [vmem:[#allocation5 + $0xf8] ss:$12 sps:$4 sm:$0xff]  }
 0x178   :  { %3180 = vmatprep.subr.bf16.mxu1 %v5167_v28  ;;  %v5157_v28 = vld [vmem:[#allocation5 + $0xe0] ss:$12 sps:$4 sm:$0xff]  }
 0x179   :  { %v1984_v29 = vpop.f32.mrf.mxu1 }
 0x17b   :  { %3181 = vmatpush1.bf16.msra.mxu1 %v5165_v7  ;;  %v5158_v7 = vld [vmem:[#allocation5 + $0x20] ss:$12 sps:$4 sm:$0xff]  }
 0x17c   :  { %3182 = vmatprep.subr.bf16.mxu1 %v5171_v30 }
 0x17f   :  { %3183 = vmatpush1.bf16.msra.mxu1 %v5169_v31  ;;  %v5159_v31 = vld [vmem:[#allocation5 + $0xc8] ss:$12 sps:$4 sm:$0xff]  }
 0x180   :  { %3184 = vmatprep.subr.bf16.mxu1 %v5175_v32 }
 0x183   :  { %3185 = vmatpush1.bf16.msra.mxu1 %v5173_v33 }
 0x184   :  { %3186 = vmatprep.subr.bf16.mxu1 %v5179_v37  ;;  %v5160_v37 = vld [vmem:[#allocation5 + $0x8] ss:$12 sps:$4 sm:$0xff]  }
 0x187   :  { %3187 = vmatpush1.bf16.msra.mxu1 %v5177_v38 }
 0x188   :  { %3188 = vmatprep.subr.bf16.mxu1 %v5183_v39 }
 0x18b   :  { %3189 = vmatpush1.bf16.msra.mxu1 %v5181_v40 }
 0x18c   :  { %3190 = vmatprep.subr.bf16.mxu1 %v5187_v41  ;;  %v5164_v41 = vld [vmem:[#allocation5 + $0x3b0] ss:$12 sps:$4 sm:$0xff]  }
 0x18f   :  { %3191 = vmatpush1.bf16.msra.mxu1 %v5185_v42 }
 0x190   :  { %3192 = vmatprep.subr.bf16.mxu1 %v5191_v24 }
 0x193   :  { %3193 = vmatpush1.bf16.msra.mxu1 %v5189_v43  ;;  %v5168_v43 = vld [vmem:[#allocation5 + $0x398] ss:$12 sps:$4 sm:$0xff]  }
 0x194   :  { %4570 = vmatprep.subr.bf16.mxu1 %v5193_v25 }
 0x1aa   :  { %v2020_v47 = vpop.f32.mrf.mxu0 }
 0x1ab   :  { %v2021_v55 = vadd.f32 %v2020_v47, %v1980_v52  ;;  %v5176_v47 = vld [vmem:[#allocation5 + $0x368] ss:$12 sps:$4 sm:$0xff]  }
 0x1ac   :  { %v2022_v49 = vpop.f32.mrf.mxu0 }
 0x1ad   :  { %v2023_v1 = vadd.f32 %v2022_v49, %v1982_v36  ;;  %v497_v49 = vrot.slane %v5582_v58, %v496_v48  ;;  %v5239_v48 = vld [vmem:[#allocation7 + $0xd0] ss:$8 sps:$4 sm:$0xff]  }
 0x1ae   :  { %v2024_v51 = vpop.f32.mrf.mxu0 }
 0x1af   :  { %v5184_v51 = vld [vmem:[#allocation5 + $0x338] ss:$12 sps:$4 sm:$0xff]  }
 0x1b0   :  { %v2025_v54 = vpop.f32.mrf.mxu0 }
 0x1b2   :  { %v2102_v62 = vpop.f32.mrf.mxu0 }
 0x1b3   :  { %v2061_v57 = vpop.f32.mrf.mxu1 }
 0x1b4   :  { %v2062_v2 = vadd.f32 %v2061_v57, %v2021_v55  ;;  %v2104_v4 = vpop.f32.mrf.mxu0  ;;  %v5188_v55 = vld [vmem:[#allocation5 + $0x320] ss:$12 sps:$4 sm:$0xff]  }
 0x1b5   :  { %v2063_v3 = vpop.f32.mrf.mxu1 }
 0x1b6   :  { %v2103_v5 = vadd.f32 %v2102_v62, %v2062_v2  ;;  %v2064_v8 = vadd.f32 %v2063_v3, %v2023_v1  ;;  %v2106_v53 = vpop.f32.mrf.mxu0 }
 0x1b7   :  { %v2065_v9 = vpop.f32.mrf.mxu1  ;;  %v5194_v53 = vld [vmem:[#allocation5 + $0x230] ss:$12 sps:$4 sm:$0xff]  }
 0x1b8   :  { %v2105_v11 = vadd.f32 %v2104_v4, %v2064_v8  ;;  %v2271_v12 = vmax.f32 %v2103_v5, 0.0  ;;  %v2107_v14 = vpop.f32.mrf.mxu0  ;;  %v5192_v4 = vld [vmem:[#allocation5 + $0x308] ss:$12 sps:$4 sm:$0xff]  }
 0x1b9   :  { %v2066_v15 = vpop.f32.mrf.mxu1  ;;  %v5197_v14 = vld [vmem:[#allocation5 + $0x2c0] ss:$12 sps:$4 sm:$0xff]  }
 0x1ba   :  { %v2272_v10 = vmax.f32 %v2105_v11, 0.0  ;;  %v5612_v18 = vpack.c.bf16 %v2271_v12, %v2271_v12  ;;  %v5195_v11 = vld [vmem:[#allocation5 + $0x2d8] ss:$12 sps:$4 sm:$0xff]   ;;  %v5198_v15 = vld [vmem:[#allocation5 + $0x200] ss:$12 sps:$4 sm:$0xff]  }
 0x1bb   :  { %v5196_v12 = vld [vmem:[#allocation5 + $0x218] ss:$12 sps:$4 sm:$0xff]  }
 0x1bc   :  { %v5610_v16 = vpack.c.bf16 %v2272_v10, %v2272_v10  ;;  %v5199_v10 = vld [vmem:[#allocation5 + $0x2a8] ss:$12 sps:$4 sm:$0xff]  }
 0x1be   :  { %3169 = vmatprep.mubr.bf16.mxu0 %v5610_v16 }
 0x1bf   :  { %3170 = vmatmul.mubr.bf16.vlgmr.msra.gmra.mxu0 %v5612_v18 }
 0x1c0   :  { %4549 = vmatpush3.bf16.msra.mxu0 %v5146_v17  ;;  %3251 = vmatprep.mubr.bf16.mxu0 %v5597_v23  ;;  %v5200_v17 = vld [vmem:[#allocation5 + $0x1e8] ss:$12 sps:$4 sm:$0xff]  }
 0x1c1   :  { %4550 = vmatprep.subr.bf16.mxu0 %v5147_v19  ;;  %v5201_v19 = vld [vmem:[#allocation5 + $0x290] ss:$12 sps:$4 sm:$0xff]  }
 0x1c4   :  { %4551 = vmatpush3.bf16.msra.mxu0 %v5148_v60  ;;  %v5202_v60 = vld [vmem:[#allocation5 + $0x1d0] ss:$12 sps:$4 sm:$0xff]  }
 0x1c5   :  { %4552 = vmatprep.subr.bf16.mxu0 %v5149_v20  ;;  %v5203_v20 = vld [vmem:[#allocation5 + $0x278] ss:$12 sps:$4 sm:$0xff]  }
 0x1c8   :  { %4553 = vmatpush3.bf16.msra.mxu0 %v5150_v63  ;;  %v5204_v63 = vld [vmem:[#allocation5 + $0x1b8] ss:$12 sps:$4 sm:$0xff]  }
 0x1c9   :  { %4554 = vmatprep.subr.bf16.mxu0 %v5151_v44  ;;  %v5206_v44 = vld [vmem:[#allocation5 + $0x1a0] ss:$12 sps:$4 sm:$0xff]  }
 0x1cc   :  { %4555 = vmatpush3.bf16.msra.mxu0 %v5152_v21  ;;  %v5208_v21 = vld [vmem:[#allocation5 + $0x188] ss:$12 sps:$4 sm:$0xff]  }
 0x1cd   :  { %4556 = vmatprep.subr.bf16.mxu0 %v5153_v61  ;;  %v5211_v61 = vld [vmem:[#allocation7 + $0x74] ss:$8 sps:$4 sm:$0xff]  }
 0x1d0   :  { %4557 = vmatpush3.bf16.msra.mxu0 %v5154_v22  ;;  %v5209_v22 = vld [vmem:[#allocation7 + $0x70] ss:$8 sps:$4 sm:$0xff]  }
 0x1d1   :  { %4558 = vmatprep.subr.bf16.mxu0 %v5155_v0  ;;  %v5214_v0 = vld [vmem:[#allocation7 + $0x64] ss:$8 sps:$4 sm:$0xff]  }
 0x1d2   :  { %v4496_v23 = vpop.f32.mrf.mxu0 }
 0x1d3   :  { %v4518_v13 = vpop.f32.mrf.mxu1 }
 0x1d4   :  { %4559 = vmatpush3.bf16.msra.mxu0 %v5156_v27  ;;  %v4497_v29 = vpop.f32.mrf.mxu0  ;;  %v5212_v27 = vld [vmem:[#allocation7 + $0x60] ss:$8 sps:$4 sm:$0xff]  }
 0x1d5   :  { %4560 = vmatprep.subr.bf16.mxu0 %v5157_v28  ;;  %v4519_v30 = vpop.f32.mrf.mxu1  ;;  %v4498_v50 = vadd.f32 %v4497_v29, %v4496_v23  ;;  %v5217_v28 = vld [vmem:[#allocation7 + $0x54] ss:$8 sps:$4 sm:$0xff]   ;;  %v5215_v23 = vld [vmem:[#allocation7 + $0x50] ss:$8 sps:$4 sm:$0xff]  }
 0x1d6   :  { %v4499_v32 = vpop.f32.mrf.mxu0  ;;  %v4520_v54 = vadd.f32 %v4519_v30, %v4518_v13  ;;  %v5220_v13 = vld [vmem:[#allocation7 + $0x44] ss:$8 sps:$4 sm:$0xff]   ;;  %v5223_v29 = vld [vmem:[#allocation7 + $0x34] ss:$8 sps:$4 sm:$0xff]   ;;  %v5221_v30 = vld [vmem:[#allocation7 + $0x30] ss:$8 sps:$4 sm:$0xff]  }
 0x1d7   :  { %v4521_v33 = vpop.f32.mrf.mxu1  ;;  %v2144_v52 = vadd.f32 %v4498_v50, %v497_v49  ;;  %v5224_v32 = vld [vmem:[#allocation7 + $0x20] ss:$8 sps:$4 sm:$0xff]   ;;  %v5247_v50 = vld [vmem:[#allocation7 + $0xb4] ss:$8 sps:$4 sm:$0xff]  }
 0x1d8   :  { %4561 = vmatpush3.bf16.msra.mxu0 %v5158_v7  ;;  %v4500_v38 = vpop.f32.mrf.mxu0  ;;  %v5218_v7 = vld [vmem:[#allocation7 + $0x40] ss:$8 sps:$4 sm:$0xff]   ;;  %v5227_v33 = vld [vmem:[#allocation7 + $0x10] ss:$8 sps:$4 sm:$0xff]  }
 0x1d9   :  { %4562 = vmatprep.subr.bf16.mxu0 %v5159_v31  ;;  %v4522_v39 = vpop.f32.mrf.mxu1  ;;  %v2184_v62 = vadd.f32 %v4520_v54, %v2144_v52  ;;  %v5226_v31 = vld [vmem:[#allocation7 + $0x24] ss:$8 sps:$4 sm:$0xff]   ;;  %v5242_v49 = vld [vmem:[#allocation7 + $0xc0] ss:$8 sps:$4 sm:$0xff]   ;;  %v5259_v52 = vld [vmem:[#allocation7 + $0x174] ss:$8 sps:$4 sm:$0xff]  }
 0x1da   :  { %v5262_v54 = vld [vmem:[#allocation7 + $0x164] ss:$8 sps:$4 sm:$0xff]  }
 0x1db   :  { %v2263_v40 = vpop.f32.mrf.mxu1 }
 0x1dc   :  { %4563 = vmatpush3.bf16.msra.mxu0 %v5160_v37  ;;  %v5232_v37 = vld [vmem:[#allocation7 + $0x4] ss:$8 sps:$4 sm:$0xff]  }
 0x1dd   :  { %4638 = vmatprep.subr.bf16.mxu0 %v5402_v35  ;;  %v4636_v42 = vpop.f32.mrf.mxu1 }
 0x1df   :  { %3252 = vmatmul.mubr.bf16.vlgmr.msra.gmra.mxu0 %v5599_v26  ;;  %v2266_v24 = vpop.f32.mrf.mxu1  ;;  %v5180_v26 = vld [vmem:[#allocation5 + $0x350] ss:$12 sps:$4 sm:$0xff]  }
 0x1e0   :  { %4639 = vmatpush3.bf16.msra.mxu0 %v5164_v41  ;;  %4654 = vmatprep.mubr.msk.bf16.mxu0 %vm5403_vm1, %v5402_v35  ;;  %v5235_v41 = vld [vmem:[#allocation7 + $0xf4] ss:$8 sps:$4 sm:$0xff]  }
 0x1e1   :  { %4640 = vmatprep.subr.bf16.mxu0 %v5402_v35  ;;  %v4637_v25 = vpop.f32.mrf.mxu1 }
 0x1e2   :  { %v5238_v25 = vld [vmem:[#allocation7 + $0xe4] ss:$8 sps:$4 sm:$0xff]  }
 0x1e4   :  { %4641 = vmatpush3.bf16.msra.mxu0 %v5168_v43  ;;  %v5233_v43 = vld [vmem:[#allocation7 + $0xf0] ss:$8 sps:$4 sm:$0xff]  }
 0x1e5   :  { %4642 = vmatprep.subr.bf16.mxu0 %v5402_v35 }
 0x1e8   :  { %4643 = vmatpush3.bf16.msra.mxu0 %v5172_v6  ;;  %v5236_v6 = vld [vmem:[#allocation7 + $0xe0] ss:$8 sps:$4 sm:$0xff]  }
 0x1e9   :  { %4644 = vmatprep.subr.bf16.mxu0 %v5402_v35 }
 0x1ec   :  { %4645 = vmatpush3.bf16.msra.mxu0 %v5176_v47  ;;  %v5241_v47 = vld [vmem:[#allocation7 + $0xd4] ss:$8 sps:$4 sm:$0xff]  }
 0x1ed   :  { %4646 = vmatprep.subr.bf16.mxu0 %v5402_v35 }
 0x1f0   :  { %4647 = vmatpush3.bf16.msra.mxu0 %v5180_v26  ;;  %v5244_v26 = vld [vmem:[#allocation7 + $0xc4] ss:$8 sps:$4 sm:$0xff]  }
 0x1f1   :  { %4648 = vmatprep.subr.bf16.mxu0 %v5402_v35 }
 0x1f2   :  { %v4540_v36 = vpop.f32.mrf.mxu0 }
 0x1f4   :  { %4649 = vmatpush3.bf16.msra.mxu0 %v5184_v51  ;;  %v4541_v57 = vpop.f32.mrf.mxu0  ;;  %v5257_v51 = vld [vmem:[#allocation7 + $0x170] ss:$8 sps:$4 sm:$0xff]  }
 0x1f5   :  { %4650 = vmatprep.subr.bf16.mxu0 %v5402_v35  ;;  %v4542_v1 = vadd.f32 %v4541_v57, %v4540_v36  ;;  %v5245_v36 = vld [vmem:[#allocation7 + $0xb0] ss:$8 sps:$4 sm:$0xff]   ;;  %v5250_v57 = vld [vmem:[#allocation7 + $0xa4] ss:$8 sps:$4 sm:$0xff]  }
 0x1f6   :  { %v4543_v2 = vpop.f32.mrf.mxu0 }
 0x1f7   :  { %v2224_v3 = vadd.f32 %v4542_v1, %v2184_v62  ;;  %v5265_v62 = vld [vmem:[#allocation7 + $0x154] ss:$8 sps:$4 sm:$0xff]   ;;  %v5248_v1 = vld [vmem:[#allocation7 + $0xa0] ss:$8 sps:$4 sm:$0xff]   ;;  %v5263_v2 = vld [vmem:[#allocation7 + $0x150] ss:$8 sps:$4 sm:$0xff]  }
 0x1f8   :  { %4651 = vmatpush3.bf16.msra.mxu0 %v5188_v55  ;;  %v4544_v58 = vpop.f32.mrf.mxu0  ;;  %v5260_v55 = vld [vmem:[#allocation7 + $0x160] ss:$8 sps:$4 sm:$0xff]  }
 0x1f9   :  { %4652 = vmatprep.subr.bf16.mxu0 %v5402_v35  ;;  %v2264_v5 = vadd.f32 %v2263_v40, %v2224_v3  ;;  %v5230_v40 = vld [vmem:[#allocation7] ss:$8 sps:$4 sm:$0xff]   ;;  %v5253_v3 = vld [vmem:[#allocation7 + $0x94] ss:$8 sps:$4 sm:$0xff]   ;;  %v5251_v58 = vld [vmem:[#allocation7 + $0x90] ss:$8 sps:$4 sm:$0xff]  }
 0x1fb   :  { %v2273_v8 = vmax.f32 %v2264_v5, 0.0  ;;  %v5266_v5 = vld [vmem:[#allocation7 + $0x140] ss:$8 sps:$4 sm:$0xff]  }
 0x1fc   :  { %4653 = vmatpush3.bf16.msra.mxu0 %v5192_v4  ;;  %v5268_v4 = vld [vmem:[#allocation7 + $0x144] ss:$8 sps:$4 sm:$0xff]  }
 0x1fd   :  { %v2278_v9 = vpack.c.bf16 %v2273_v8, %v2273_v8  ;;  %3686 = vmatprep.subr.bf16.mxu0 %v5259_v52  ;;  %v5256_v8 = vld [vmem:[#allocation7 + $0x84] ss:$8 sps:$4 sm:$0xff]  }
 0x1ff   :  { %3211 = vmatmul.mubr.bf16.vlgmr.msra.gmra.mxu1 %v2278_v9  ;;  %4655 = vmatmul.mubr.bf16.vlgmr.msra.gmra.mxu0 %v2278_v9  ;;  %v5254_v9 = vld [vmem:[#allocation7 + $0x80] ss:$8 sps:$4 sm:$0xff]  }
 0x200   :  { %4571 = vmatpush3.bf16.msra.mxu1 %v5194_v53  ;;  %3291 = vmatprep.mubr.bf16.mxu1 %v5610_v16  ;;  %v5205_v16 = vld [vmem:[#allocation5 + $0x260] ss:$12 sps:$4 sm:$0xff]   ;;  %v5271_v53 = vld [vmem:[#allocation7 + $0x134] ss:$8 sps:$4 sm:$0xff]  }
 0x201   :  { %4572 = vmatprep.subr.bf16.mxu1 %v5195_v11  ;;  %3718 = vmatprep.mubr.bf16.mxu0 %v5401_v34  ;;  %v5207_v34 = vld [vmem:[#allocation5 + $0x248] ss:$12 sps:$4 sm:$0xff]   ;;  %v5269_v11 = vld [vmem:[#allocation7 + $0x130] ss:$8 sps:$4 sm:$0xff]  }
 0x202   :  { %3687 = vmatpush1.bf16.msra.mxu0 %v5257_v51 }
 0x203   :  { %3688 = vmatprep.subr.bf16.mxu0 %v5262_v54 }
 0x204   :  { %4573 = vmatpush3.bf16.msra.mxu1 %v5196_v12  ;;  %v5274_v12 = vld [vmem:[#allocation7 + $0x124] ss:$8 sps:$4 sm:$0xff]  }
 0x205   :  { %4574 = vmatprep.subr.bf16.mxu1 %v5197_v14  ;;  %v5272_v14 = vld [vmem:[#allocation7 + $0x120] ss:$8 sps:$4 sm:$0xff]  }
 0x206   :  { %3689 = vmatpush1.bf16.msra.mxu0 %v5260_v55 }
 0x207   :  { %3690 = vmatprep.subr.bf16.mxu0 %v5265_v62  ;;  %v5284_v62 = vld [vmem:[%s5749_s7 + $0x30] sm:$0xff]  }
 0x208   :  { %4575 = vmatpush3.bf16.msra.mxu1 %v5198_v15  ;;  %v5277_v15 = vld [vmem:[#allocation7 + $0x114] ss:$8 sps:$4 sm:$0xff]  }
 0x209   :  { %4576 = vmatprep.subr.bf16.mxu1 %v5199_v10  ;;  %v5275_v10 = vld [vmem:[#allocation7 + $0x110] ss:$8 sps:$4 sm:$0xff]  }
 0x20a   :  { %3691 = vmatpush1.bf16.msra.mxu0 %v5263_v2  ;;  %v5286_v2 = vld [vmem:[%s5749_s7 + $0x28] sm:$0xff]  }
 0x20b   :  { %3692 = vmatprep.subr.bf16.mxu0 %v5268_v4  ;;  %v5288_v4 = vld [vmem:[%s5749_s7 + $0x20] sm:$0xff]  }
 0x20c   :  { %4577 = vmatpush3.bf16.msra.mxu1 %v5200_v17  ;;  %v5280_v17 = vld [vmem:[#allocation7 + $0x104] ss:$8 sps:$4 sm:$0xff]  }
 0x20d   :  { %4578 = vmatprep.subr.bf16.mxu1 %v5201_v19  ;;  %v5278_v19 = vld [vmem:[#allocation7 + $0x100] ss:$8 sps:$4 sm:$0xff]  }
 0x20e   :  { %3693 = vmatpush1.bf16.msra.mxu0 %v5266_v5  ;;  %v5290_v5 = vld [vmem:[%s5749_s7 + $0x18] sm:$0xff]  }
 0x20f   :  { %3694 = vmatprep.subr.bf16.mxu0 %v5271_v53  ;;  %v5292_v53 = vld [vmem:[%s5749_s7 + $0x10] sm:$0xff]  }
 0x210   :  { %4579 = vmatpush3.bf16.msra.mxu1 %v5202_v60  ;;  %v2439_v60 = vld [vmem:[%s5746_s4] sm:$0x7] }
 0x211   :  { %4580 = vmatprep.subr.bf16.mxu1 %v5203_v20  ;;  %v2444_v20 = vrot.slane %v2439_v60, %v5577_v56 }
 0x212   :  { %3695 = vmatpush1.bf16.msra.mxu0 %v5269_v11  ;;  %v5294_v11 = vld [vmem:[%s5749_s7 + $0x8] sm:$0xff]  }
 0x213   :  { %3696 = vmatprep.subr.bf16.mxu0 %v5274_v12  ;;  %v5295_v12 = vld [vmem:[%s5749_s7 + $0x40] sm:$0xff]  }
 0x214   :  { %4581 = vmatpush3.bf16.msra.mxu1 %v5204_v63 }
 0x215   :  { %4582 = vmatprep.subr.bf16.mxu1 %v5205_v16 }
 0x216   :  { %3697 = vmatpush1.bf16.msra.mxu0 %v5272_v14  ;;  %v5296_v14 = vld [vmem:[%s5749_s7] sm:$0xff]  }
 0x217   :  { %3698 = vmatprep.subr.bf16.mxu0 %v5277_v15  ;;  %v5297_v15 = vld [vmem:[%s5751_s9 + $0x38] sm:$0xff]  }
 0x218   :  { %4583 = vmatpush3.bf16.msra.mxu1 %v5206_v44 }
 0x219   :  { %4584 = vmatprep.subr.bf16.mxu1 %v5207_v34 }
 0x21a   :  { %3699 = vmatpush1.bf16.msra.mxu0 %v5275_v10  ;;  %v5298_v10 = vld [vmem:[%s5751_s9 + $0x30] sm:$0xff]  }
 0x21b   :  { %3700 = vmatprep.subr.bf16.mxu0 %v5280_v17  ;;  %v5299_v17 = vld [vmem:[%s5751_s9 + $0x28] sm:$0xff]  }
 0x21c   :  { %4585 = vmatpush3.bf16.msra.mxu1 %v5208_v21 }
 0x21d   :  { %3645 = vmatprep.subr.bf16.mxu1 %v5211_v61 }
 0x21e   :  { %3701 = vmatpush1.bf16.msra.mxu0 %v5278_v19  ;;  %v5300_v19 = vld [vmem:[%s5751_s9 + $0x20] sm:$0xff]  }
 0x21f   :  { %3292 = vmatmul.mubr.bf16.vlgmr.msra.gmra.mxu1 %v5612_v18  ;;  %v5229_v18 = vld [vmem:[#allocation7 + $0x14] ss:$8 sps:$4 sm:$0xff]  }
 0x220   :  { %3646 = vmatpush1.bf16.msra.mxu1 %v5209_v22 }
 0x221   :  { %3647 = vmatprep.subr.bf16.mxu1 %v5214_v0 }
 0x224   :  { %3648 = vmatpush1.bf16.msra.mxu1 %v5212_v27 }
 0x225   :  { %3649 = vmatprep.subr.bf16.mxu1 %v5217_v28 }
 0x228   :  { %3650 = vmatpush1.bf16.msra.mxu1 %v5215_v23  ;;  %v2448_v23 = vrot.slane %v2439_v60, %v5585_v59 }
 0x229   :  { %3651 = vmatprep.subr.bf16.mxu1 %v5220_v13 }
 0x22c   :  { %3652 = vmatpush1.bf16.msra.mxu1 %v5218_v7 }
 0x22d   :  { %3653 = vmatprep.subr.bf16.mxu1 %v5223_v29 }
 0x230   :  { %3654 = vmatpush1.bf16.msra.mxu1 %v5221_v30 }
 0x231   :  { %3655 = vmatprep.subr.bf16.mxu1 %v5226_v31 }
 0x234   :  { %3656 = vmatpush1.bf16.msra.mxu1 %v5224_v32 }
 0x235   :  { %3657 = vmatprep.subr.bf16.mxu1 %v5229_v18 }
 0x236   :  { %v5633_v38 = vpop.f32.mrf.mxu1 }
 0x237   :  { %v3131_v63 = vadd.f32 %v5633_v38, %v2444_v20 }
 0x238   :  { %v5635_v39 = vpop.f32.mrf.mxu1  ;;  %3658 = vmatpush1.bf16.msra.mxu1 %v5227_v33 }
 0x239   :  { %3659 = vmatprep.subr.bf16.mxu1 %v5232_v37  ;;  %v3133_v13 = vadd.f32 %v5635_v39, %v2448_v23  ;;  %v2452_v39 = vrot.slane %v2439_v60, %v488_v45  ;;  %v5283_v45 = vld [vmem:[%s5749_s7 + $0x70] sm:$0xff]   ;;  %v5301_v60 = vld [vmem:[%s5751_s9 + $0x18] sm:$0xff]  }
 0x23a   :  { %v3134_v42 = vpop.f32.mrf.mxu1 }
 0x23c   :  { %v3135_v24 = vpop.f32.mrf.mxu1  ;;  %3660 = vmatpush1.bf16.msra.mxu1 %v5230_v40 }
 0x23d   :  { %3661 = vmatprep.subr.bf16.mxu1 %v5235_v41 }
 0x240   :  { %3662 = vmatpush2.bf16.msra.mxu1 %v5233_v43 }
 0x241   :  { %3663 = vmatprep.subr.bf16.mxu1 %v5238_v25 }
 0x244   :  { %3664 = vmatpush2.bf16.msra.mxu1 %v5236_v6 }
 0x245   :  { %3665 = vmatprep.subr.bf16.mxu1 %v5241_v47 }
 0x248   :  { %3666 = vmatpush2.bf16.msra.mxu1 %v5239_v48 }
 0x249   :  { %3667 = vmatprep.subr.bf16.mxu1 %v5244_v26 }
 0x24c   :  { %3668 = vmatpush2.bf16.msra.mxu1 %v5242_v49 }
 0x24d   :  { %3669 = vmatprep.subr.bf16.mxu1 %v5247_v50 }
 0x250   :  { %3670 = vmatpush2.bf16.msra.mxu1 %v5245_v36 }
 0x251   :  { %3671 = vmatprep.subr.bf16.mxu1 %v5250_v57  ;;  %v5281_v57 = vld [vmem:[%s5749_s7 + $0x78] sm:$0xff]  }
 0x252   :  { %4601 = vmatprep.subr.bf16.mxu0 %v5281_v57 }
 0x254   :  { %3672 = vmatpush2.bf16.msra.mxu1 %v5248_v1  ;;  %v5285_v1 = vld [vmem:[%s5749_s7 + $0x68] sm:$0xff]  }
 0x255   :  { %3673 = vmatprep.subr.bf16.mxu1 %v5253_v3  ;;  %v5287_v3 = vld [vmem:[%s5749_s7 + $0x60] sm:$0xff]  }
 0x258   :  { %3674 = vmatpush2.bf16.msra.mxu1 %v5251_v58  ;;  %v5289_v58 = vld [vmem:[%s5749_s7 + $0x58] sm:$0xff]  }
 0x259   :  { %3675 = vmatprep.subr.bf16.mxu1 %v5256_v8  ;;  %v5291_v8 = vld [vmem:[%s5749_s7 + $0x50] sm:$0xff]  }
 0x25c   :  { %3676 = vmatpush2.bf16.msra.mxu1 %v5254_v9  ;;  %v5293_v9 = vld [vmem:[%s5749_s7 + $0x48] sm:$0xff]  }
 0x25d   :  { %4658 = vmatprep.subr.bf16.mxu1 %v5402_v35 }
 0x27f   :  { %v3171_v16 = vpop.f32.mrf.mxu0 }
 0x280   :  { %v3172_v44 = vadd.f32 %v3171_v16, %v3131_v63 }
 0x281   :  { %v3173_v34 = vpop.f32.mrf.mxu0 }
 0x282   :  { %v3174_v30 = vadd.f32 %v3173_v34, %v3133_v13  ;;  %v3393_v34 = vld [vmem:[%s5748_s6] sm:$0x3] }
 0x283   :  { %v3175_v21 = vpop.f32.mrf.mxu0 }
 0x284   :  { %v3398_v21 = vrot.slane %v3393_v34, %v5577_v56  ;;  %v5302_v56 = vld [vmem:[%s5751_s9 + $0x10] sm:$0xff]  }
 0x285   :  { %v3176_v61 = vpop.f32.mrf.mxu0 }
 0x286   :  { %v3402_v61 = vrot.slane %v3393_v34, %v5585_v59  ;;  %v5303_v59 = vld [vmem:[%s5751_s9 + $0x8] sm:$0xff]  }
 0x29f   :  { %v4564_v22 = vpop.f32.mrf.mxu0 }
 0x2a1   :  { %v4565_v0 = vpop.f32.mrf.mxu0 }
 0x2a2   :  { %v4566_v6 = vadd.f32 %v4565_v0, %v4564_v22 }
 0x2a3   :  { %v4567_v27 = vpop.f32.mrf.mxu0 }
 0x2a4   :  { %v3254_v26 = vadd.f32 %v4566_v6, %v2452_v39 }
 0x2a5   :  { %v4568_v28 = vpop.f32.mrf.mxu0 }
 0x2bf   :  { %v3212_v7 = vpop.f32.mrf.mxu1  ;;  %v3333_v29 = vpop.f32.mrf.mxu0 }
 0x2c0   :  { %v3213_v31 = vadd.f32 %v3212_v7, %v3172_v44 }
 0x2c1   :  { %v3214_v32 = vpop.f32.mrf.mxu1  ;;  %v4656_v18 = vpop.f32.mrf.mxu0 }
 0x2c2   :  { %v3215_v33 = vadd.f32 %v3214_v32, %v3174_v30  ;;  %v3339_v37 = vmax.f32 %v3213_v31, 0.0 }
 0x2c3   :  { %v3216_v38 = vpop.f32.mrf.mxu1  ;;  %v3336_v40 = vpop.f32.mrf.mxu0 }
 0x2c4   :  { %v3340_v41 = vmax.f32 %v3215_v33, 0.0  ;;  %v3342_v25 = vpack.c.bf16 %v3339_v37, %v3339_v37  ;;  %v5304_v33 = vld [vmem:[%s5751_s9] sm:$0xff]  }
 0x2c5   :  { %v3217_v42 = vpop.f32.mrf.mxu1  ;;  %v4657_v24 = vpop.f32.mrf.mxu0  ;;  %v4454_v38 = vld [vmem:[%s5750_s8] ss:$0 sm:$0xff] }
 0x2c6   :  { %v3343_v43 = vpack.c.bf16 %v3340_v41, %v3340_v41 }
 0x2c8   :  { %3677 = vmatprep.mubr.bf16.mxu1 %v3343_v43 }
 0x2c9   :  { %3678 = vmatmul.mubr.bf16.vlgmr.msra.gmra.mxu1 %v3342_v25 }
 0x2ca   :  { %4674 = vmatprep.mubr.msk.bf16.mxu1 %vm5403_vm1, %v5402_v35  ;;  %4659 = vmatpush3.bf16.msra.mxu1 %v5297_v15 }
 0x2cb   :  { %4660 = vmatprep.subr.bf16.mxu1 %v5402_v35 }
 0x2ce   :  { %4661 = vmatpush3.bf16.msra.mxu1 %v5298_v10 }
 0x2cf   :  { %4662 = vmatprep.subr.bf16.mxu1 %v5402_v35 }
 0x2d2   :  { %4663 = vmatpush3.bf16.msra.mxu1 %v5299_v17 }
 0x2d3   :  { %4664 = vmatprep.subr.bf16.mxu1 %v5402_v35 }
 0x2d6   :  { %4665 = vmatpush3.bf16.msra.mxu1 %v5300_v19 }
 0x2d7   :  { %4666 = vmatprep.subr.bf16.mxu1 %v5402_v35 }
 0x2da   :  { %4667 = vmatpush3.bf16.msra.mxu1 %v5301_v60 }
 0x2db   :  { %4668 = vmatprep.subr.bf16.mxu1 %v5402_v35 }
 0x2de   :  { %4669 = vmatpush3.bf16.msra.mxu1 %v5302_v56 }
 0x2df   :  { %v4586_v47 = vpop.f32.mrf.mxu1  ;;  %4670 = vmatprep.subr.bf16.mxu1 %v5402_v35 }
 0x2e1   :  { %v4587_v48 = vpop.f32.mrf.mxu1 }
 0x2e2   :  { %v4588_v49 = vadd.f32 %v4587_v48, %v4586_v47  ;;  %4671 = vmatpush3.bf16.msra.mxu1 %v5303_v59 }
 0x2e3   :  { %v4589_v50 = vpop.f32.mrf.mxu1  ;;  %4672 = vmatprep.subr.bf16.mxu1 %v5402_v35  ;;  %v4471_v35 = vld [vmem:[%s5752_s10] ss:$0 sm:$0xff] }
 0x2e4   :  { %v3294_v51 = vadd.f32 %v4588_v49, %v3254_v26 }
 0x2e5   :  { %v4590_v52 = vpop.f32.mrf.mxu1 }
 0x2e6   :  { %v3334_v54 = vadd.f32 %v3333_v29, %v3294_v51  ;;  %4673 = vmatpush3.bf16.msra.mxu1 %v5304_v33 }
 0x2e8   :  { %v3341_v36 = vmax.f32 %v3334_v54, 0.0 }
 0x2ea   :  { %v3344_v55 = vpack.c.bf16 %v3341_v36, %v3341_v36 }
 0x2ec   :  { %3719 = vmatmul.mubr.bf16.vlgmr.msra.gmra.mxu0 %v3344_v55 }
 0x2ed   :  { %4602 = vmatpush3.bf16.msra.mxu0 %v5282_v46 }
 0x2ee   :  { %4603 = vmatprep.subr.bf16.mxu0 %v5283_v45 }
 0x2f1   :  { %4604 = vmatpush3.bf16.msra.mxu0 %v5284_v62 }
 0x2f2   :  { %4605 = vmatprep.subr.bf16.mxu0 %v5285_v1 }
 0x2f5   :  { %4606 = vmatpush3.bf16.msra.mxu0 %v5286_v2 }
 0x2f6   :  { %4607 = vmatprep.subr.bf16.mxu0 %v5287_v3 }
 0x2f9   :  { %4608 = vmatpush3.bf16.msra.mxu0 %v5288_v4 }
 0x2fa   :  { %4609 = vmatprep.subr.bf16.mxu0 %v5289_v58 }
 0x2fd   :  { %4610 = vmatpush3.bf16.msra.mxu0 %v5290_v5 }
 0x2fe   :  { %4611 = vmatprep.subr.bf16.mxu0 %v5291_v8 }
 0x301   :  { %4612 = vmatpush3.bf16.msra.mxu0 %v5292_v53 }
 0x302   :  { %4613 = vmatprep.subr.bf16.mxu0 %v5293_v9 }
 0x305   :  { %4614 = vmatpush3.bf16.msra.mxu0 %v5294_v11 }
 0x306   :  { %4615 = vmatprep.subr.bf16.mxu0 %v5295_v12 }
 0x309   :  { %4616 = vmatpush3.bf16.msra.mxu0 %v5296_v14 }
 0x389   :  { %v3679_v20 = vpop.f32.mrf.mxu1 }
 0x38a   :  { %v3680_v22 = vadd.f32 %v3679_v20, %v3398_v21 }
 0x38b   :  { %v3681_v63 = vpop.f32.mrf.mxu1 }
 0x38c   :  { %v3682_v27 = vadd.f32 %v3681_v63, %v3402_v61 }
 0x38d   :  { %v3683_v16 = vpop.f32.mrf.mxu1 }
 0x38f   :  { %v3684_v44 = vpop.f32.mrf.mxu1 }
 0x3ac   :  { %v3720_v0 = vpop.f32.mrf.mxu0 }
 0x3ad   :  { %v3721_v28 = vadd.f32 %v3720_v0, %v3680_v22 }
 0x3ae   :  { %v3722_v23 = vpop.f32.mrf.mxu0 }
 0x3af   :  { %v3723_v13 = vadd.f32 %v3722_v23, %v3682_v27  ;;  %v3727_v7 = vmax.f32 %v3721_v28, 0.0 }
 0x3b0   :  { %v3724_v29 = vpop.f32.mrf.mxu0 }
 0x3b1   :  { %v3728_v30 = vmax.f32 %v3723_v13, 0.0  ;;  %v3729_v18 = vpack.c.bf16 %v3727_v7, %v3727_v7 }
 0x3b2   :  { %v3725_v31 = vpop.f32.mrf.mxu0 }
 0x3b3   :  { %v3730_v32 = vpack.c.bf16 %v3728_v30, %v3728_v30 }
 0x3b5   :  { %3898 = vmatprep.mubr.bf16.mxu0 %v3730_v32 }
 0x3b6   :  { %3899 = vmatmul.mubr.bf16.vlgmr.msra.gmra.mxu0 %v3729_v18 }
 0x476   :  { %v4617_v37 = vpop.f32.mrf.mxu0 }
 0x478   :  { %v4618_v40 = vpop.f32.mrf.mxu0 }
 0x479   :  { %v4619_v41 = vadd.f32 %v4618_v40, %v4617_v37 }
 0x47a   :  { %v4620_v42 = vpop.f32.mrf.mxu0 }
 0x47b   :  { %v3901_v24 = vadd.f32 %v4619_v41, %v4454_v38 }
 0x47c   :  { %v4621_v43 = vpop.f32.mrf.mxu0 }
 0x47d   :  { %v3906_v25 = vmax.f32 %v3901_v24, 0.0 }
 0x47f   :  { %v3907_v39 = vpack.c.bf16 %v3906_v25, %v3906_v25 }
 0x481   :  { %4675 = vmatmul.mubr.bf16.vlgmr.msra.gmra.mxu1 %v3907_v39 }
 0x541   :  { %v4013_v6 = vpop.f32.mrf.mxu1 }
 0x542   :  { %v4014_v47 = vadd.f32 %v4471_v35, %v4013_v6 }
 0x543   :  { %v4676_v48 = vpop.f32.mrf.mxu1 }
 0x544   :  { %4019 = vst [vmem:[#allocation8] sm:$0xff] %v4014_v47 }
 0x545   :  { %v4016_v26 = vpop.f32.mrf.mxu1 }
 0x547   :  { %v4677_v49 = vpop.f32.mrf.mxu1 }
 0x548   :  { %4024 = vsyncadd [#allocation4], 96  ;;  %s5404_s8 = smov [#allocation8]  }
 0x549   :  { %s4025_s9 = sshll.u32 %s5404_s8, 4  ;;  %s4026_s9 = int_to_ptr.vmem [resolvable:$true] %s4025_s9 }
 0x54a   :  { %s5365_s15 = scalar_lea.vmem %s4026_s9, 32  ;;  %s5369_s16 = scalar_lea.vmem %s4026_s9, 128 }
 0x54b   :  { %p5366_p1 = scmp.ne.s32.totalorder %s4026_s9, %s5365_s15  ;;  %p5370_p2 = scmp.lt.s32.totalorder %s4026_s9, %s4026_s9 }
 0x54c   :  { %p5371_p3 = scmp.lt.s32.totalorder %s5369_s16, %s5365_s15 }
 0x54e   :  { %p5372_p4 = por %p5371_p3, %p5370_p2 }
 0x550   :  { %p5373_p5 = pnand %p5372_p4, %p5366_p1 }
 0x552   :  { %5376 = shalt.err (!%p5373_p5)
}
 0x553   :  { %s5405_s17 = smov 32   ;;  %s5406_s10 = smov 2  }
 0x554   :  { %4031 = dma.vmem_to_hbm [thread:$0]  %s4026_s9, 32, %s5753_s11, [#allocation4], %s5405_s17, %s5405_s17, %s5406_s10  }
 0x555   :  { %5389 = dma.done.wait [#allocation4], 128  }
 0x556   :  { %5390 = vsyncadd [#allocation4], 4294967168 }
 0x557   :  { %4035 = vsyncpa [#allocation3], 1 }
 0x558   :  { %4036 = vsyncpa [#allocation6], 1 }
 0x559   :  { %4037 = vsyncpa [#allocation4], 1 }

</bundles_post_ra>
